<compile_context>
chip_gen: v7x
topology: tpu7x:2x2x1
jax: 0.10.0
libtpu: 0.0.40
codegen_flags: <defaults>
</compile_context>

<pallas_src>
import math
import functools

import numpy as np
import jax
import jax.numpy as jnp
from jax import lax
from jax.experimental import pallas as pl
from jax.experimental.pallas import tpu as pltpu

_EPS = 1e-5
_NEG = -65000.0
_BF16 = jnp.bfloat16
_F32 = jnp.float32


def _norm_stats(x):
    """LayerNorm normalization (no affine); stats shared by multiple norms."""
    mean = jnp.mean(x, axis=-1, keepdims=True)
    xc = x - mean
    var = jnp.mean(xc * xc, axis=-1, keepdims=True)
    return xc * lax.rsqrt(var + _EPS)


# ----------------------- kernel 1: fused attention ---------------------------

def _attn_kernel(h_ref, cc_ref, cr_ref, ln_ref, wqk_ref, wv_ref, r2_ref,
                 wo_ref, bias_ref, a_ref, *, BB, T, TM, M, NH, DH, D,
                 mask_shift_len):
    x = h_ref[...]                                   # (BB*T, D) f32
    xn = _norm_stats(x)                              # one mean/var pass, two affines
    xw = xn * ln_ref[0:1, :] + ln_ref[1:2, :]        # Weights.norm affine
    xv = xn * ln_ref[2:3, :] + ln_ref[3:4, :]        # Values.norm affine

    # Fused q|k projection and v projection over all BB*T rows (fills MXU rows).
    qk = jnp.dot(xw.astype(_BF16), wqk_ref[...], preferred_element_type=_F32)
    v2 = jnp.dot(xv.astype(_BF16), wv_ref[...], preferred_element_type=_F32)
    r2 = r2_ref[...]                                 # (TM, NH*DH) f32 (precomputed)

    scale = 1.0 / math.sqrt(DH)
    dn_t = (((1,), (1,)), ((), ()))                  # A @ B.T on the MXU

    # Static (batch independent) mask + rel_shift machinery, hoisted.
    row = lax.broadcasted_iota(jnp.int32, (T, TM), 0)
    col = lax.broadcasted_iota(jnp.int32, (T, TM), 1)
    static_mask = (col >= row + M) | (col <= row + (M - mask_shift_len))
    shift_amt = (T - 1) - row                        # per-row left shift for rel_shift
    shift_stages = []
    s = 1
    while s < T:
        shift_stages.append(((shift_amt & s) != 0, s, jnp.zeros((T, s), _F32)))
        s *= 2

    for bb in range(BB):                             # static, BB small
        r0 = bb * T
        cc = cc_ref[r0:r0 + T, :]                    # (T, 1)  cum resets (query)
        cr = cr_ref[bb]                              # (1, TM) cum resets (key)
        masked = (cc > cr) | static_mask             # (T, TM) bool; True = masked out
        maskf = jnp.where(masked, 1.0, 0.0)
        all_masked = jnp.min(maskf, axis=-1, keepdims=True) > 0.5

        heads = []
        for n in range(NH):                          # static head loop (NH small)
            qh = qk[r0:r0 + T, n * DH:(n + 1) * DH]
            kh = qk[r0:r0 + T, NH * DH + n * DH:NH * DH + (n + 1) * DH]
            vh = v2[r0:r0 + T, n * DH:(n + 1) * DH]
            rh = r2[:, n * DH:(n + 1) * DH]
            kb = bias_ref[n:n + 1, :]
            rb = bias_ref[NH + n:NH + n + 1, :]
            cs = lax.dot_general((qh + kb).astype(_BF16), kh.astype(_BF16),
                                 dn_t, preferred_element_type=_F32)      # (T, TM)
            ps = lax.dot_general((qh + rb).astype(_BF16), rh.astype(_BF16),
                                 dn_t, preferred_element_type=_F32)      # (T, TM)
            # rel_shift: row p needs a left shift by (T-1-p) on the key axis.
            # log2(T)-stage barrel shifter (zero fill); shifted-out slots only land on
            # positions with key >= query + M, which the future mask overwrites.
            for bit, sh, zpad in shift_stages:
                shifted = jnp.concatenate([ps[:, sh:], zpad], axis=1)
                ps = jnp.where(bit, shifted, ps)
            score = (cs + ps) * scale
            score = jnp.where(masked, _NEG, score)
            mx = jnp.max(score, axis=-1, keepdims=True)                  # f32 softmax
            e = jnp.exp(score - mx)
            denom = jnp.sum(e, axis=-1, keepdims=True)
            prob = e * pl.reciprocal(denom, approx=True)
            prob = jnp.where(all_masked, 0.0, prob)
            heads.append(jnp.dot(prob.astype(_BF16), vh.astype(_BF16),
                                 preferred_element_type=_F32))           # (T, DH)
        summ = jnp.concatenate(heads, axis=1)                            # (T, NH*DH)
        out = jnp.dot(summ.astype(_BF16), wo_ref[...],
                      preferred_element_type=_F32)                       # (T, D)
        a_ref[r0:r0 + T, :] = jnp.maximum(out, 0.0).astype(a_ref.dtype)  # relu(o(.))


# ----------------------- kernel 2: gate -> ff -> gate ------------------------

def _gate(x, y, wu, ug, b, D):
    # wu packs [Wr | Wz | Wg | Ur | Uz] -> one lane-dense (rows, 5D) matmul.
    yw = jnp.dot(y.astype(_BF16), wu, preferred_element_type=_F32)
    r = jax.nn.sigmoid(yw[:, :D] + yw[:, 3 * D:4 * D])
    z = jax.nn.sigmoid(yw[:, D:2 * D] + yw[:, 4 * D:] - b)
    hcand = jnp.tanh(yw[:, 2 * D:3 * D]
                     + jnp.dot((r * x).astype(_BF16), ug,
                               preferred_element_type=_F32))
    return (1.0 - z) * x + z * hcand


def _gate_ff_kernel(x_ref, y_ref, g1wu_ref, g1ug_ref, ffw_ref,
                    g2wu_ref, g2ug_ref, vec_ref, o_ref, *, D):
    g1b = vec_ref[0:1, :]
    ffg = vec_ref[1:2, :]
    ffb = vec_ref[2:3, :]
    ffbias = vec_ref[3:4, :]
    g2b = vec_ref[4:5, :]
    x = x_ref[...]
    h1 = _gate(x, y_ref[...], g1wu_ref[...], g1ug_ref[...], g1b, D)
    xn = _norm_stats(h1) * ffg + ffb
    ff = jnp.maximum(
        jnp.dot(xn.astype(_BF16), ffw_ref[...],
                preferred_element_type=_F32) + ffbias, 0.0)
    o_ref[...] = _gate(h1, ff, g2wu_ref[...], g2ug_ref[...], g2b, D)


# ----------------------------- parameters ------------------------------------

def init_params(key, d_model, n_head, d_head):
    D, NHDH = d_model, n_head * d_head
    ks = jax.random.split(key, 16)

    def lin(k, out_f, in_f):
        return (1.0 / math.sqrt(in_f)) * jax.random.normal(k, (out_f, in_f),
                                                           jnp.float32)

    def gate(kk):
        k1, k2, k3 = jax.random.split(kk, 3)
        return {'W': lin(k1, 3 * D, D), 'U': lin(k2, 2 * D, D),
                'Ug': lin(k3, D, D), 'b': jnp.full((1, D), 2.0, jnp.float32)}

    p = {
        'w_q': lin(ks[0], NHDH, D), 'w_k': lin(ks[1], NHDH, D),
        'w_r': lin(ks[2], NHDH, D), 'w_v': lin(ks[3], NHDH, D),
        'w_o': lin(ks[4], D, NHDH),
        'k_bias': jax.random.normal(ks[5], (n_head, d_head), jnp.float32),
        'r_bias': jax.random.normal(ks[6], (n_head, d_head), jnp.float32),
        'ln_w_g': jnp.ones((1, D), jnp.float32), 'ln_w_b': jnp.zeros((1, D), jnp.float32),
        'ln_v_g': jnp.ones((1, D), jnp.float32), 'ln_v_b': jnp.zeros((1, D), jnp.float32),
        'attn_gate': gate(ks[7]), 'ff_gate': gate(ks[8]),
        'ff_ln_g': jnp.ones((1, D), jnp.float32), 'ff_ln_b': jnp.zeros((1, D), jnp.float32),
        'ff_w': lin(ks[9], D, D),
        'ff_b': (1.0 / math.sqrt(D)) * jax.random.normal(ks[10], (1, D), jnp.float32),
    }
    return p


# ----------------------------- forward wrapper -------------------------------

def gated_attention(h, reset, p, *, mem_len, n_head, d_head):
    T, B, D = h.shape
    NH, DH = n_head, d_head
    NHDH = NH * DH
    M = 0                      # fresh recurrence.State => empty memory
    TM = T + M
    mask_len = M + T - mem_len
    mask_shift_len = (T - mask_len) if mask_len > 0 else T

    # --- tiny XLA glue: positional embedding (+ its projection), reset counts ---
    inv_freq = 2.0 * np.pi / (1024.0 ** (np.arange(0, D, 2, dtype=np.float32) / D))
    pos_seq = np.flip(np.arange(TM, dtype=np.float32))
    sin_inp = pos_seq[:, None] * inv_freq[None, :]
    pe = jnp.asarray(np.concatenate([np.sin(sin_inp), np.cos(sin_inp)], axis=-1))
    r2 = jnp.dot(pe.astype(_BF16), p['w_r'].T.astype(_BF16),
                 preferred_element_type=_F32)                            # (TM, NHDH)

    # ResetMasker (fresh state): query i can't see key j iff a reset occurred in (j, i],
    # i.e. cumulative reset count of i exceeds that of j.  Only the per-token counts
    # travel through HBM; the (T, TM) mask is rebuilt in-kernel.
    cum = jnp.cumsum(reset.astype(jnp.int32), axis=0).T                  # (B, T)
    cum_col = cum.reshape(B * T, 1)                                      # query counts
    cum_row = cum.reshape(B, 1, TM)                                      # key counts (M=0)

    # Weight packing: fused q|k, packed biases, fused gate W|U, bf16 MXU operands.
    wqk = jnp.concatenate([p['w_q'].T, p['w_k'].T], axis=1).astype(_BF16)  # (D, 2*NHDH)
    wv = p['w_v'].T.astype(_BF16)
    wo = p['w_o'].T.astype(_BF16)                                          # (NHDH, D)
    ln = jnp.concatenate([p['ln_w_g'], p['ln_w_b'],
                          p['ln_v_g'], p['ln_v_b']], axis=0)               # (4, D)
    bias = jnp.concatenate([p['k_bias'], p['r_bias']], axis=0)             # (2*NH, DH)

    hb = jnp.transpose(h, (1, 0, 2))                                       # (B, T, D)
    h_rows = hb.reshape(B * T, D)

    # Batches per grid step: fill the MXU rows (target ~256), keep >=2 parallel steps
    # for megacore when the problem is big enough, keep row blocks tile-aligned.
    if B * T <= 256:
        BB = B
    else:
        BB = max(1, min(B, 256 // max(T, 1)))
        while B % BB:
            BB -= 1
        if B // BB < 2:
            half = max(1, BB // 2)
            while B % half:
                half -= 1
            BB = half
    if BB != B and (BB * T) % 16 != 0:
        BB = B  # full-array block is always legal

    attn = pl.pallas_call(
        functools.partial(_attn_kernel, BB=BB, T=T, TM=TM, M=M, NH=NH, DH=DH,
                          D=D, mask_shift_len=mask_shift_len),
        out_shape=jax.ShapeDtypeStruct((B * T, D), _BF16),
        grid=(B // BB,),
        in_specs=[
            pl.BlockSpec((BB * T, D), lambda b: (b, 0)),        # h rows (per batch blk)
            pl.BlockSpec((BB * T, 1), lambda b: (b, 0)),        # cum resets (query)
            pl.BlockSpec((BB, 1, TM), lambda b: (b, 0, 0)),     # cum resets (key)
            pl.BlockSpec((4, D), lambda b: (0, 0)),             # 2x LN gamma/beta
            pl.BlockSpec((D, 2 * NHDH), lambda b: (0, 0)),      # Wq|Wk
            pl.BlockSpec((D, NHDH), lambda b: (0, 0)),          # Wv
            pl.BlockSpec((TM, NHDH), lambda b: (0, 0)),         # pe @ Wr
            pl.BlockSpec((NHDH, D), lambda b: (0, 0)),          # Wo
            pl.BlockSpec((2 * NH, DH), lambda b: (0, 0)),       # k_bias|r_bias
        ],
        out_specs=pl.BlockSpec((BB * T, D), lambda b: (b, 0)),
        compiler_params=pltpu.CompilerParams(
            dimension_semantics=("parallel",),
            vmem_limit_bytes=48 * 1024 * 1024),
    )
    a_rows = attn(h_rows, cum_col, cum_row, ln, wqk, wv, r2, wo, bias)   # (B*T, D) bf16

    # --- gate -> ff -> gate over (B*T, D) rows --------------------------------
    R = B * T
    TR = 256 if R >= 256 else R
    R_pad = ((R + TR - 1) // TR) * TR
    x_rows = h_rows
    a_in = a_rows
    if R_pad != R:
        x_rows = jnp.pad(x_rows, ((0, R_pad - R), (0, 0)))
        a_in = jnp.pad(a_in, ((0, R_pad - R), (0, 0)))

    def pack_gate(gp):
        wu = jnp.concatenate([gp['W'], gp['U']], axis=0).T.astype(_BF16)  # (D, 5D)
        return wu, gp['Ug'].T.astype(_BF16)

    g1wu, g1ug = pack_gate(p['attn_gate'])
    g2wu, g2ug = pack_gate(p['ff_gate'])
    ffw = p['ff_w'].T.astype(_BF16)
    vecs = jnp.concatenate([p['attn_gate']['b'], p['ff_ln_g'], p['ff_ln_b'],
                            p['ff_b'], p['ff_gate']['b'],
                            jnp.zeros((3, D), jnp.float32)], axis=0)       # (8, D)

    row_spec = pl.BlockSpec((TR, D), lambda i: (i, 0))

    def w_spec(shape):
        return pl.BlockSpec(shape, lambda i: (0, 0))

    out_rows = pl.pallas_call(
        functools.partial(_gate_ff_kernel, D=D),
        out_shape=jax.ShapeDtypeStruct((R_pad, D), jnp.float32),
        grid=(R_pad // TR,),
        in_specs=[
            row_spec, row_spec,
            w_spec((D, 5 * D)), w_spec((D, D)), w_spec((D, D)),
            w_spec((D, 5 * D)), w_spec((D, D)), w_spec((8, D)),
        ],
        out_specs=row_spec,
        compiler_params=pltpu.CompilerParams(
            dimension_semantics=("parallel",),
            vmem_limit_bytes=48 * 1024 * 1024),
    )(x_rows, a_in, g1wu, g1ug, ffw, g2wu, g2ug, vecs)

    return jnp.transpose(out_rows[:R].reshape(B, T, D), (1, 0, 2))


if __name__ == "__main__":
    T, B, D, NH, DH, MEM_LEN = 8, 2, 32, 2, 16, 8
    key = jax.random.PRNGKey(0)
    kh, kr, kp = jax.random.split(key, 3)
    h = jax.random.normal(kh, (T, B, D), jnp.float32)
    reset = jax.random.bernoulli(kr, 0.3, (T, B))
    params = init_params(kp, D, NH, DH)

    out = gated_attention(h, reset, params, mem_len=MEM_LEN, n_head=NH, d_head=DH)
    out = jax.block_until_ready(out)
    assert out.shape == (T, B, D)
    assert bool(jnp.all(jnp.isfinite(out)))
    print("KERNEL_OK")
</pallas_src>

<mosaic_0001>
module attributes {stable_mosaic.version = 11 : i64} {
  func.func @_attn_kernel(%arg0: i32, %arg1: memref<16x32xf32, #tpu.memory_space<vmem>>, %arg2: memref<16x1xi32, #tpu.memory_space<vmem>>, %arg3: memref<2x1x8xi32, #tpu.memory_space<vmem>>, %arg4: memref<4x32xf32, #tpu.memory_space<vmem>>, %arg5: memref<32x64xbf16, #tpu.memory_space<vmem>>, %arg6: memref<32x32xbf16, #tpu.memory_space<vmem>>, %arg7: memref<8x32xf32, #tpu.memory_space<vmem>>, %arg8: memref<32x32xbf16, #tpu.memory_space<vmem>>, %arg9: memref<4x16xf32, #tpu.memory_space<vmem>>, %arg10: memref<16x32xbf16, #tpu.memory_space<vmem>>) attributes {dimension_semantics = [#tpu.dimension_semantics<parallel>], iteration_bounds = array<i64: 1>, scalar_prefetch = 0 : i64, scratch_operands = 0 : i64, tpu.core_type = #tpu.core_type<tc>, window_params = [{transform_indices = @transform_0, window_bounds = array<i64: 16, 32>}, {transform_indices = @transform_1, window_bounds = array<i64: 16, 1>}, {transform_indices = @transform_2, window_bounds = array<i64: 2, 1, 8>}, {pipeline_mode = #tpu.pipeline_mode<synchronous>, transform_indices = @transform_3, window_bounds = array<i64: 4, 32>}, {pipeline_mode = #tpu.pipeline_mode<synchronous>, transform_indices = @transform_4, window_bounds = array<i64: 32, 64>}, {pipeline_mode = #tpu.pipeline_mode<synchronous>, transform_indices = @transform_5, window_bounds = array<i64: 32, 32>}, {pipeline_mode = #tpu.pipeline_mode<synchronous>, transform_indices = @transform_6, window_bounds = array<i64: 8, 32>}, {pipeline_mode = #tpu.pipeline_mode<synchronous>, transform_indices = @transform_7, window_bounds = array<i64: 32, 32>}, {pipeline_mode = #tpu.pipeline_mode<synchronous>, transform_indices = @transform_8, window_bounds = array<i64: 4, 16>}, {transform_indices = @transform_9, window_bounds = array<i64: 16, 32>}]} {
    %c0 = arith.constant 0 : index
    %c0_0 = arith.constant 0 : index
    %0 = vector.load %arg1[%c0, %c0_0] : memref<16x32xf32, #tpu.memory_space<vmem>>, vector<16x32xf32>
    %cst = arith.constant dense<0.000000e+00> : vector<16xf32>
    %1 = vector.multi_reduction <add>, %0, %cst [1] : vector<16x32xf32> to vector<16xf32>
    %2 = vector.shape_cast %1 : vector<16xf32> to vector<16x1xf32>
    %cst_1 = arith.constant 3.200000e+01 : f32
    %3 = vector.broadcast %cst_1 : f32 to vector<16x1xf32>
    %4 = arith.divf %2, %3 : vector<16x1xf32>
    %5 = vector.broadcast %4 : vector<16x1xf32> to vector<16x32xf32>
    %6 = arith.subf %0, %5 : vector<16x32xf32>
    %7 = arith.mulf %6, %6 : vector<16x32xf32>
    %cst_2 = arith.constant dense<0.000000e+00> : vector<16xf32>
    %8 = vector.multi_reduction <add>, %7, %cst_2 [1] : vector<16x32xf32> to vector<16xf32>
    %9 = vector.shape_cast %8 : vector<16xf32> to vector<16x1xf32>
    %cst_3 = arith.constant 3.200000e+01 : f32
    %10 = vector.broadcast %cst_3 : f32 to vector<16x1xf32>
    %11 = arith.divf %9, %10 : vector<16x1xf32>
    %cst_4 = arith.constant 9.99999974E-6 : f32
    %12 = vector.broadcast %cst_4 : f32 to vector<16x1xf32>
    %13 = arith.addf %11, %12 : vector<16x1xf32>
    %14 = math.rsqrt %13 : vector<16x1xf32>
    %15 = vector.broadcast %14 : vector<16x1xf32> to vector<16x32xf32>
    %16 = arith.mulf %6, %15 : vector<16x32xf32>
    %c0_5 = arith.constant 0 : index
    %c0_6 = arith.constant 0 : index
    %17 = vector.load %arg4[%c0_5, %c0_6] : memref<4x32xf32, #tpu.memory_space<vmem>>, vector<1x32xf32>
    %18 = vector.broadcast %17 : vector<1x32xf32> to vector<16x32xf32>
    %19 = arith.mulf %16, %18 : vector<16x32xf32>
    %c1 = arith.constant 1 : index
    %c0_7 = arith.constant 0 : index
    %20 = vector.load %arg4[%c1, %c0_7] : memref<4x32xf32, #tpu.memory_space<vmem>>, vector<1x32xf32>
    %21 = vector.broadcast %20 : vector<1x32xf32> to vector<16x32xf32>
    %22 = arith.addf %19, %21 : vector<16x32xf32>
    %c2 = arith.constant 2 : index
    %c0_8 = arith.constant 0 : index
    %23 = vector.load %arg4[%c2, %c0_8] : memref<4x32xf32, #tpu.memory_space<vmem>>, vector<1x32xf32>
    %24 = vector.broadcast %23 : vector<1x32xf32> to vector<16x32xf32>
    %25 = arith.mulf %16, %24 : vector<16x32xf32>
    %c3 = arith.constant 3 : index
    %c0_9 = arith.constant 0 : index
    %26 = vector.load %arg4[%c3, %c0_9] : memref<4x32xf32, #tpu.memory_space<vmem>>, vector<1x32xf32>
    %27 = vector.broadcast %26 : vector<1x32xf32> to vector<16x32xf32>
    %28 = arith.addf %25, %27 : vector<16x32xf32>
    %29 = arith.truncf %22 : vector<16x32xf32> to vector<16x32xbf16>
    %c0_10 = arith.constant 0 : index
    %c0_11 = arith.constant 0 : index
    %30 = vector.load %arg5[%c0_10, %c0_11] : memref<32x64xbf16, #tpu.memory_space<vmem>>, vector<32x64xbf16>
    %cst_12 = arith.constant dense<0.000000e+00> : vector<16x64xf32>
    %31 = tpu.matmul %29, %30, %cst_12 {dimension_numbers = #tpu.dot_dimension_numbers<[1], [0], [0], [1], [0, 0, 1, 1], [], []>} : vector<16x32xbf16>, vector<32x64xbf16>, vector<16x64xf32> -> vector<16x64xf32>
    %32 = arith.truncf %28 : vector<16x32xf32> to vector<16x32xbf16>
    %c0_13 = arith.constant 0 : index
    %c0_14 = arith.constant 0 : index
    %33 = vector.load %arg6[%c0_13, %c0_14] : memref<32x32xbf16, #tpu.memory_space<vmem>>, vector<32x32xbf16>
    %cst_15 = arith.constant dense<0.000000e+00> : vector<16x32xf32>
    %34 = tpu.matmul %32, %33, %cst_15 {dimension_numbers = #tpu.dot_dimension_numbers<[1], [0], [0], [1], [0, 0, 1, 1], [], []>} : vector<16x32xbf16>, vector<32x32xbf16>, vector<16x32xf32> -> vector<16x32xf32>
    %c0_16 = arith.constant 0 : index
    %c0_17 = arith.constant 0 : index
    %35 = vector.load %arg7[%c0_16, %c0_17] : memref<8x32xf32, #tpu.memory_space<vmem>>, vector<8x32xf32>
    %36 = tpu.iota {dimensions = array<i32: 0>} : vector<8x8xi32>
    %37 = tpu.iota {dimensions = array<i32: 1>} : vector<8x8xi32>
    %c0_i32 = arith.constant 0 : i32
    %38 = vector.broadcast %c0_i32 : i32 to vector<8x8xi32>
    %39 = arith.addi %36, %38 : vector<8x8xi32>
    %40 = arith.cmpi sge, %37, %39 : vector<8x8xi32>
    %c-8_i32 = arith.constant -8 : i32
    %41 = vector.broadcast %c-8_i32 : i32 to vector<8x8xi32>
    %42 = arith.addi %36, %41 : vector<8x8xi32>
    %43 = arith.cmpi sle, %37, %42 : vector<8x8xi32>
    %44 = arith.ori %40, %43 : vector<8x8xi1>
    %c7_i32 = arith.constant 7 : i32
    %45 = vector.broadcast %c7_i32 : i32 to vector<8x8xi32>
    %46 = arith.subi %45, %36 : vector<8x8xi32>
    %c1_i32 = arith.constant 1 : i32
    %47 = vector.broadcast %c1_i32 : i32 to vector<8x8xi32>
    %48 = arith.andi %46, %47 : vector<8x8xi32>
    %c0_i32_18 = arith.constant 0 : i32
    %49 = vector.broadcast %c0_i32_18 : i32 to vector<8x8xi32>
    %50 = arith.cmpi ne, %48, %49 : vector<8x8xi32>
    %cst_19 = arith.constant 0.000000e+00 : f32
    %51 = vector.broadcast %cst_19 : f32 to vector<8x1xf32>
    %c2_i32 = arith.constant 2 : i32
    %52 = vector.broadcast %c2_i32 : i32 to vector<8x8xi32>
    %53 = arith.andi %46, %52 : vector<8x8xi32>
    %c0_i32_20 = arith.constant 0 : i32
    %54 = vector.broadcast %c0_i32_20 : i32 to vector<8x8xi32>
    %55 = arith.cmpi ne, %53, %54 : vector<8x8xi32>
    %cst_21 = arith.constant 0.000000e+00 : f32
    %56 = vector.broadcast %cst_21 : f32 to vector<8x2xf32>
    %c4_i32 = arith.constant 4 : i32
    %57 = vector.broadcast %c4_i32 : i32 to vector<8x8xi32>
    %58 = arith.andi %46, %57 : vector<8x8xi32>
    %c0_i32_22 = arith.constant 0 : i32
    %59 = vector.broadcast %c0_i32_22 : i32 to vector<8x8xi32>
    %60 = arith.cmpi ne, %58, %59 : vector<8x8xi32>
    %cst_23 = arith.constant 0.000000e+00 : f32
    %61 = vector.broadcast %cst_23 : f32 to vector<8x4xf32>
    %c0_24 = arith.constant 0 : index
    %c0_25 = arith.constant 0 : index
    %62 = vector.load %arg2[%c0_24, %c0_25] : memref<16x1xi32, #tpu.memory_space<vmem>>, vector<8x1xi32>
    %c0_26 = arith.constant 0 : index
    %c0_27 = arith.constant 0 : index
    %c0_28 = arith.constant 0 : index
    %63 = vector.load %arg3[%c0_26, %c0_27, %c0_28] : memref<2x1x8xi32, #tpu.memory_space<vmem>>, vector<1x1x8xi32>
    %64 = vector.shape_cast %63 : vector<1x1x8xi32> to vector<1x8xi32>
    %65 = vector.broadcast %62 : vector<8x1xi32> to vector<8x8xi32>
    %66 = vector.broadcast %64 : vector<1x8xi32> to vector<8x8xi32>
    %67 = arith.cmpi sgt, %65, %66 : vector<8x8xi32>
    %68 = arith.ori %67, %44 : vector<8x8xi1>
    %cst_29 = arith.constant 1.000000e+00 : f32
    %cst_30 = arith.constant 0.000000e+00 : f32
    %69 = vector.broadcast %cst_29 : f32 to vector<8x8xf32>
    %70 = vector.broadcast %cst_30 : f32 to vector<8x8xf32>
    %71 = arith.select %68, %69, %70 : vector<8x8xi1>, vector<8x8xf32>
    %cst_31 = arith.constant dense<0x7F800000> : vector<8xf32>
    %72 = vector.multi_reduction <minimumf>, %71, %cst_31 [1] : vector<8x8xf32> to vector<8xf32>
    %73 = vector.shape_cast %72 : vector<8xf32> to vector<8x1xf32>
    %cst_32 = arith.constant 5.000000e-01 : f32
    %74 = vector.broadcast %cst_32 : f32 to vector<8x1xf32>
    %75 = arith.cmpf ogt, %73, %74 : vector<8x1xf32>
    %76 = vector.extract_strided_slice %31 {offsets = [0, 0], sizes = [8, 16], strides = [1, 1]} : vector<16x64xf32> to vector<8x16xf32>
    %77 = vector.extract_strided_slice %31 {offsets = [0, 32], sizes = [8, 16], strides = [1, 1]} : vector<16x64xf32> to vector<8x16xf32>
    %78 = vector.extract_strided_slice %34 {offsets = [0, 0], sizes = [8, 16], strides = [1, 1]} : vector<16x32xf32> to vector<8x16xf32>
    %79 = vector.extract_strided_slice %35 {offsets = [0, 0], sizes = [8, 16], strides = [1, 1]} : vector<8x32xf32> to vector<8x16xf32>
    %c0_33 = arith.constant 0 : index
    %c0_34 = arith.constant 0 : index
    %80 = vector.load %arg9[%c0_33, %c0_34] : memref<4x16xf32, #tpu.memory_space<vmem>>, vector<1x16xf32>
    %c2_35 = arith.constant 2 : index
    %c0_36 = arith.constant 0 : index
    %81 = vector.load %arg9[%c2_35, %c0_36] : memref<4x16xf32, #tpu.memory_space<vmem>>, vector<1x16xf32>
    %82 = vector.broadcast %80 : vector<1x16xf32> to vector<8x16xf32>
    %83 = arith.addf %76, %82 : vector<8x16xf32>
    %84 = arith.truncf %83 : vector<8x16xf32> to vector<8x16xbf16>
    %85 = arith.truncf %77 : vector<8x16xf32> to vector<8x16xbf16>
    %cst_37 = arith.constant dense<0.000000e+00> : vector<8x8xf32>
    %86 = tpu.matmul %84, %85, %cst_37 {dimension_numbers = #tpu.dot_dimension_numbers<[1], [1], [0], [0], [0, 0, 1, 0], [], []>} : vector<8x16xbf16>, vector<8x16xbf16>, vector<8x8xf32> -> vector<8x8xf32>
    %87 = vector.broadcast %81 : vector<1x16xf32> to vector<8x16xf32>
    %88 = arith.addf %76, %87 : vector<8x16xf32>
    %89 = arith.truncf %88 : vector<8x16xf32> to vector<8x16xbf16>
    %90 = arith.truncf %79 : vector<8x16xf32> to vector<8x16xbf16>
    %cst_38 = arith.constant dense<0.000000e+00> : vector<8x8xf32>
    %91 = tpu.matmul %89, %90, %cst_38 {dimension_numbers = #tpu.dot_dimension_numbers<[1], [1], [0], [0], [0, 0, 1, 0], [], []>} : vector<8x16xbf16>, vector<8x16xbf16>, vector<8x8xf32> -> vector<8x8xf32>
    %92 = vector.extract_strided_slice %91 {offsets = [0, 1], sizes = [8, 7], strides = [1, 1]} : vector<8x8xf32> to vector<8x7xf32>
    %93 = tpu.concatenate %92, %51 in 1 : vector<8x7xf32>, vector<8x1xf32> -> vector<8x8xf32>
    %94 = arith.select %50, %93, %91 : vector<8x8xi1>, vector<8x8xf32>
    %95 = vector.extract_strided_slice %94 {offsets = [0, 2], sizes = [8, 6], strides = [1, 1]} : vector<8x8xf32> to vector<8x6xf32>
    %96 = tpu.concatenate %95, %56 in 1 : vector<8x6xf32>, vector<8x2xf32> -> vector<8x8xf32>
    %97 = arith.select %55, %96, %94 : vector<8x8xi1>, vector<8x8xf32>
    %98 = vector.extract_strided_slice %97 {offsets = [0, 4], sizes = [8, 4], strides = [1, 1]} : vector<8x8xf32> to vector<8x4xf32>
    %99 = tpu.concatenate %98, %61 in 1 : vector<8x4xf32>, vector<8x4xf32> -> vector<8x8xf32>
    %100 = arith.select %60, %99, %97 : vector<8x8xi1>, vector<8x8xf32>
    %101 = arith.addf %86, %100 : vector<8x8xf32>
    %cst_39 = arith.constant 2.500000e-01 : f32
    %102 = vector.broadcast %cst_39 : f32 to vector<8x8xf32>
    %103 = arith.mulf %101, %102 : vector<8x8xf32>
    %cst_40 = arith.constant -6.500000e+04 : f32
    %104 = vector.broadcast %cst_40 : f32 to vector<8x8xf32>
    %105 = arith.select %68, %104, %103 : vector<8x8xi1>, vector<8x8xf32>
    %cst_41 = arith.constant dense<0xFF800000> : vector<8xf32>
    %106 = vector.multi_reduction <maximumf>, %105, %cst_41 [1] : vector<8x8xf32> to vector<8xf32>
    %107 = vector.shape_cast %106 : vector<8xf32> to vector<8x1xf32>
    %108 = vector.broadcast %107 : vector<8x1xf32> to vector<8x8xf32>
    %109 = arith.subf %105, %108 : vector<8x8xf32>
    %110 = math.exp %109 : vector<8x8xf32>
    %cst_42 = arith.constant dense<0.000000e+00> : vector<8xf32>
    %111 = vector.multi_reduction <add>, %110, %cst_42 [1] : vector<8x8xf32> to vector<8xf32>
    %112 = vector.shape_cast %111 : vector<8xf32> to vector<8x1xf32>
    %113 = tpu.reciprocal %112 {approx = true} : vector<8x1xf32> -> vector<8x1xf32>
    %114 = vector.broadcast %113 : vector<8x1xf32> to vector<8x8xf32>
    %115 = arith.mulf %110, %114 : vector<8x8xf32>
    %cst_43 = arith.constant 0.000000e+00 : f32
    %116 = vector.shape_cast %75 : vector<8x1xi1> to vector<8x1xi1>
    %117 = vector.broadcast %116 : vector<8x1xi1> to vector<8x8xi1>
    %118 = vector.broadcast %cst_43 : f32 to vector<8x8xf32>
    %119 = arith.select %117, %118, %115 : vector<8x8xi1>, vector<8x8xf32>
    %120 = arith.truncf %119 : vector<8x8xf32> to vector<8x8xbf16>
    %121 = arith.truncf %78 : vector<8x16xf32> to vector<8x16xbf16>
    %cst_44 = arith.constant dense<0.000000e+00> : vector<8x16xf32>
    %122 = tpu.matmul %120, %121, %cst_44 {dimension_numbers = #tpu.dot_dimension_numbers<[1], [0], [0], [1], [0, 0, 1, 1], [], []>} : vector<8x8xbf16>, vector<8x16xbf16>, vector<8x16xf32> -> vector<8x16xf32>
    %123 = vector.extract_strided_slice %31 {offsets = [0, 16], sizes = [8, 16], strides = [1, 1]} : vector<16x64xf32> to vector<8x16xf32>
    %124 = vector.extract_strided_slice %31 {offsets = [0, 48], sizes = [8, 16], strides = [1, 1]} : vector<16x64xf32> to vector<8x16xf32>
    %125 = vector.extract_strided_slice %34 {offsets = [0, 16], sizes = [8, 16], strides = [1, 1]} : vector<16x32xf32> to vector<8x16xf32>
    %126 = vector.extract_strided_slice %35 {offsets = [0, 16], sizes = [8, 16], strides = [1, 1]} : vector<8x32xf32> to vector<8x16xf32>
    %c1_45 = arith.constant 1 : index
    %c0_46 = arith.constant 0 : index
    %127 = vector.load %arg9[%c1_45, %c0_46] : memref<4x16xf32, #tpu.memory_space<vmem>>, vector<1x16xf32>
    %c3_47 = arith.constant 3 : index
    %c0_48 = arith.constant 0 : index
    %128 = vector.load %arg9[%c3_47, %c0_48] : memref<4x16xf32, #tpu.memory_space<vmem>>, vector<1x16xf32>
    %129 = vector.broadcast %127 : vector<1x16xf32> to vector<8x16xf32>
    %130 = arith.addf %123, %129 : vector<8x16xf32>
    %131 = arith.truncf %130 : vector<8x16xf32> to vector<8x16xbf16>
    %132 = arith.truncf %124 : vector<8x16xf32> to vector<8x16xbf16>
    %cst_49 = arith.constant dense<0.000000e+00> : vector<8x8xf32>
    %133 = tpu.matmul %131, %132, %cst_49 {dimension_numbers = #tpu.dot_dimension_numbers<[1], [1], [0], [0], [0, 0, 1, 0], [], []>} : vector<8x16xbf16>, vector<8x16xbf16>, vector<8x8xf32> -> vector<8x8xf32>
    %134 = vector.broadcast %128 : vector<1x16xf32> to vector<8x16xf32>
    %135 = arith.addf %123, %134 : vector<8x16xf32>
    %136 = arith.truncf %135 : vector<8x16xf32> to vector<8x16xbf16>
    %137 = arith.truncf %126 : vector<8x16xf32> to vector<8x16xbf16>
    %cst_50 = arith.constant dense<0.000000e+00> : vector<8x8xf32>
    %138 = tpu.matmul %136, %137, %cst_50 {dimension_numbers = #tpu.dot_dimension_numbers<[1], [1], [0], [0], [0, 0, 1, 0], [], []>} : vector<8x16xbf16>, vector<8x16xbf16>, vector<8x8xf32> -> vector<8x8xf32>
    %139 = vector.extract_strided_slice %138 {offsets = [0, 1], sizes = [8, 7], strides = [1, 1]} : vector<8x8xf32> to vector<8x7xf32>
    %140 = tpu.concatenate %139, %51 in 1 : vector<8x7xf32>, vector<8x1xf32> -> vector<8x8xf32>
    %141 = arith.select %50, %140, %138 : vector<8x8xi1>, vector<8x8xf32>
    %142 = vector.extract_strided_slice %141 {offsets = [0, 2], sizes = [8, 6], strides = [1, 1]} : vector<8x8xf32> to vector<8x6xf32>
    %143 = tpu.concatenate %142, %56 in 1 : vector<8x6xf32>, vector<8x2xf32> -> vector<8x8xf32>
    %144 = arith.select %55, %143, %141 : vector<8x8xi1>, vector<8x8xf32>
    %145 = vector.extract_strided_slice %144 {offsets = [0, 4], sizes = [8, 4], strides = [1, 1]} : vector<8x8xf32> to vector<8x4xf32>
    %146 = tpu.concatenate %145, %61 in 1 : vector<8x4xf32>, vector<8x4xf32> -> vector<8x8xf32>
    %147 = arith.select %60, %146, %144 : vector<8x8xi1>, vector<8x8xf32>
    %148 = arith.addf %133, %147 : vector<8x8xf32>
    %cst_51 = arith.constant 2.500000e-01 : f32
    %149 = vector.broadcast %cst_51 : f32 to vector<8x8xf32>
    %150 = arith.mulf %148, %149 : vector<8x8xf32>
    %cst_52 = arith.constant -6.500000e+04 : f32
    %151 = vector.broadcast %cst_52 : f32 to vector<8x8xf32>
    %152 = arith.select %68, %151, %150 : vector<8x8xi1>, vector<8x8xf32>
    %cst_53 = arith.constant dense<0xFF800000> : vector<8xf32>
    %153 = vector.multi_reduction <maximumf>, %152, %cst_53 [1] : vector<8x8xf32> to vector<8xf32>
    %154 = vector.shape_cast %153 : vector<8xf32> to vector<8x1xf32>
    %155 = vector.broadcast %154 : vector<8x1xf32> to vector<8x8xf32>
    %156 = arith.subf %152, %155 : vector<8x8xf32>
    %157 = math.exp %156 : vector<8x8xf32>
    %cst_54 = arith.constant dense<0.000000e+00> : vector<8xf32>
    %158 = vector.multi_reduction <add>, %157, %cst_54 [1] : vector<8x8xf32> to vector<8xf32>
    %159 = vector.shape_cast %158 : vector<8xf32> to vector<8x1xf32>
    %160 = tpu.reciprocal %159 {approx = true} : vector<8x1xf32> -> vector<8x1xf32>
    %161 = vector.broadcast %160 : vector<8x1xf32> to vector<8x8xf32>
    %162 = arith.mulf %157, %161 : vector<8x8xf32>
    %cst_55 = arith.constant 0.000000e+00 : f32
    %163 = vector.shape_cast %75 : vector<8x1xi1> to vector<8x1xi1>
    %164 = vector.broadcast %163 : vector<8x1xi1> to vector<8x8xi1>
    %165 = vector.broadcast %cst_55 : f32 to vector<8x8xf32>
    %166 = arith.select %164, %165, %162 : vector<8x8xi1>, vector<8x8xf32>
    %167 = arith.truncf %166 : vector<8x8xf32> to vector<8x8xbf16>
    %168 = arith.truncf %125 : vector<8x16xf32> to vector<8x16xbf16>
    %cst_56 = arith.constant dense<0.000000e+00> : vector<8x16xf32>
    %169 = tpu.matmul %167, %168, %cst_56 {dimension_numbers = #tpu.dot_dimension_numbers<[1], [0], [0], [1], [0, 0, 1, 1], [], []>} : vector<8x8xbf16>, vector<8x16xbf16>, vector<8x16xf32> -> vector<8x16xf32>
    %170 = tpu.concatenate %122, %169 in 1 : vector<8x16xf32>, vector<8x16xf32> -> vector<8x32xf32>
    %171 = arith.truncf %170 : vector<8x32xf32> to vector<8x32xbf16>
    %c0_57 = arith.constant 0 : index
    %c0_58 = arith.constant 0 : index
    %172 = vector.load %arg8[%c0_57, %c0_58] : memref<32x32xbf16, #tpu.memory_space<vmem>>, vector<32x32xbf16>
    %cst_59 = arith.constant dense<0.000000e+00> : vector<8x32xf32>
    %173 = tpu.matmul %171, %172, %cst_59 {dimension_numbers = #tpu.dot_dimension_numbers<[1], [0], [0], [1], [0, 0, 1, 1], [], []>} : vector<8x32xbf16>, vector<32x32xbf16>, vector<8x32xf32> -> vector<8x32xf32>
    %cst_60 = arith.constant 0.000000e+00 : f32
    %174 = vector.broadcast %cst_60 : f32 to vector<8x32xf32>
    %175 = arith.maximumf %173, %174 : vector<8x32xf32>
    %176 = arith.truncf %175 : vector<8x32xf32> to vector<8x32xbf16>
    %c0_61 = arith.constant 0 : index
    %c0_62 = arith.constant 0 : index
    %177 = vector.load %arg10[%c0_61, %c0_62] : memref<16x32xbf16, #tpu.memory_space<vmem>>, vector<8x32xbf16>
    tpu.vector_store %arg10[%c0_61, %c0_62], %176 {strides = array<i32>} : memref<16x32xbf16, #tpu.memory_space<vmem>>, vector<8x32xbf16>,
    %c8 = arith.constant 8 : index
    %c0_63 = arith.constant 0 : index
    %178 = vector.load %arg2[%c8, %c0_63] : memref<16x1xi32, #tpu.memory_space<vmem>>, vector<8x1xi32>
    %c1_64 = arith.constant 1 : index
    %c0_65 = arith.constant 0 : index
    %c0_66 = arith.constant 0 : index
    %179 = vector.load %arg3[%c1_64, %c0_65, %c0_66] : memref<2x1x8xi32, #tpu.memory_space<vmem>>, vector<1x1x8xi32>
    %180 = vector.shape_cast %179 : vector<1x1x8xi32> to vector<1x8xi32>
    %181 = vector.broadcast %178 : vector<8x1xi32> to vector<8x8xi32>
    %182 = vector.broadcast %180 : vector<1x8xi32> to vector<8x8xi32>
    %183 = arith.cmpi sgt, %181, %182 : vector<8x8xi32>
    %184 = arith.ori %183, %44 : vector<8x8xi1>
    %cst_67 = arith.constant 1.000000e+00 : f32
    %cst_68 = arith.constant 0.000000e+00 : f32
    %185 = vector.broadcast %cst_67 : f32 to vector<8x8xf32>
    %186 = vector.broadcast %cst_68 : f32 to vector<8x8xf32>
    %187 = arith.select %184, %185, %186 : vector<8x8xi1>, vector<8x8xf32>
    %cst_69 = arith.constant dense<0x7F800000> : vector<8xf32>
    %188 = vector.multi_reduction <minimumf>, %187, %cst_69 [1] : vector<8x8xf32> to vector<8xf32>
    %189 = vector.shape_cast %188 : vector<8xf32> to vector<8x1xf32>
    %cst_70 = arith.constant 5.000000e-01 : f32
    %190 = vector.broadcast %cst_70 : f32 to vector<8x1xf32>
    %191 = arith.cmpf ogt, %189, %190 : vector<8x1xf32>
    %192 = vector.extract_strided_slice %31 {offsets = [8, 0], sizes = [8, 16], strides = [1, 1]} : vector<16x64xf32> to vector<8x16xf32>
    %193 = vector.extract_strided_slice %31 {offsets = [8, 32], sizes = [8, 16], strides = [1, 1]} : vector<16x64xf32> to vector<8x16xf32>
    %194 = vector.extract_strided_slice %34 {offsets = [8, 0], sizes = [8, 16], strides = [1, 1]} : vector<16x32xf32> to vector<8x16xf32>
    %195 = vector.extract_strided_slice %35 {offsets = [0, 0], sizes = [8, 16], strides = [1, 1]} : vector<8x32xf32> to vector<8x16xf32>
    %c0_71 = arith.constant 0 : index
    %c0_72 = arith.constant 0 : index
    %196 = vector.load %arg9[%c0_71, %c0_72] : memref<4x16xf32, #tpu.memory_space<vmem>>, vector<1x16xf32>
    %c2_73 = arith.constant 2 : index
    %c0_74 = arith.constant 0 : index
    %197 = vector.load %arg9[%c2_73, %c0_74] : memref<4x16xf32, #tpu.memory_space<vmem>>, vector<1x16xf32>
    %198 = vector.broadcast %196 : vector<1x16xf32> to vector<8x16xf32>
    %199 = arith.addf %192, %198 : vector<8x16xf32>
    %200 = arith.truncf %199 : vector<8x16xf32> to vector<8x16xbf16>
    %201 = arith.truncf %193 : vector<8x16xf32> to vector<8x16xbf16>
    %cst_75 = arith.constant dense<0.000000e+00> : vector<8x8xf32>
    %202 = tpu.matmul %200, %201, %cst_75 {dimension_numbers = #tpu.dot_dimension_numbers<[1], [1], [0], [0], [0, 0, 1, 0], [], []>} : vector<8x16xbf16>, vector<8x16xbf16>, vector<8x8xf32> -> vector<8x8xf32>
    %203 = vector.broadcast %197 : vector<1x16xf32> to vector<8x16xf32>
    %204 = arith.addf %192, %203 : vector<8x16xf32>
    %205 = arith.truncf %204 : vector<8x16xf32> to vector<8x16xbf16>
    %206 = arith.truncf %195 : vector<8x16xf32> to vector<8x16xbf16>
    %cst_76 = arith.constant dense<0.000000e+00> : vector<8x8xf32>
    %207 = tpu.matmul %205, %206, %cst_76 {dimension_numbers = #tpu.dot_dimension_numbers<[1], [1], [0], [0], [0, 0, 1, 0], [], []>} : vector<8x16xbf16>, vector<8x16xbf16>, vector<8x8xf32> -> vector<8x8xf32>
    %208 = vector.extract_strided_slice %207 {offsets = [0, 1], sizes = [8, 7], strides = [1, 1]} : vector<8x8xf32> to vector<8x7xf32>
    %209 = tpu.concatenate %208, %51 in 1 : vector<8x7xf32>, vector<8x1xf32> -> vector<8x8xf32>
    %210 = arith.select %50, %209, %207 : vector<8x8xi1>, vector<8x8xf32>
    %211 = vector.extract_strided_slice %210 {offsets = [0, 2], sizes = [8, 6], strides = [1, 1]} : vector<8x8xf32> to vector<8x6xf32>
    %212 = tpu.concatenate %211, %56 in 1 : vector<8x6xf32>, vector<8x2xf32> -> vector<8x8xf32>
    %213 = arith.select %55, %212, %210 : vector<8x8xi1>, vector<8x8xf32>
    %214 = vector.extract_strided_slice %213 {offsets = [0, 4], sizes = [8, 4], strides = [1, 1]} : vector<8x8xf32> to vector<8x4xf32>
    %215 = tpu.concatenate %214, %61 in 1 : vector<8x4xf32>, vector<8x4xf32> -> vector<8x8xf32>
    %216 = arith.select %60, %215, %213 : vector<8x8xi1>, vector<8x8xf32>
    %217 = arith.addf %202, %216 : vector<8x8xf32>
    %cst_77 = arith.constant 2.500000e-01 : f32
    %218 = vector.broadcast %cst_77 : f32 to vector<8x8xf32>
    %219 = arith.mulf %217, %218 : vector<8x8xf32>
    %cst_78 = arith.constant -6.500000e+04 : f32
    %220 = vector.broadcast %cst_78 : f32 to vector<8x8xf32>
    %221 = arith.select %184, %220, %219 : vector<8x8xi1>, vector<8x8xf32>
    %cst_79 = arith.constant dense<0xFF800000> : vector<8xf32>
    %222 = vector.multi_reduction <maximumf>, %221, %cst_79 [1] : vector<8x8xf32> to vector<8xf32>
    %223 = vector.shape_cast %222 : vector<8xf32> to vector<8x1xf32>
    %224 = vector.broadcast %223 : vector<8x1xf32> to vector<8x8xf32>
    %225 = arith.subf %221, %224 : vector<8x8xf32>
    %226 = math.exp %225 : vector<8x8xf32>
    %cst_80 = arith.constant dense<0.000000e+00> : vector<8xf32>
    %227 = vector.multi_reduction <add>, %226, %cst_80 [1] : vector<8x8xf32> to vector<8xf32>
    %228 = vector.shape_cast %227 : vector<8xf32> to vector<8x1xf32>
    %229 = tpu.reciprocal %228 {approx = true} : vector<8x1xf32> -> vector<8x1xf32>
    %230 = vector.broadcast %229 : vector<8x1xf32> to vector<8x8xf32>
    %231 = arith.mulf %226, %230 : vector<8x8xf32>
    %cst_81 = arith.constant 0.000000e+00 : f32
    %232 = vector.shape_cast %191 : vector<8x1xi1> to vector<8x1xi1>
    %233 = vector.broadcast %232 : vector<8x1xi1> to vector<8x8xi1>
    %234 = vector.broadcast %cst_81 : f32 to vector<8x8xf32>
    %235 = arith.select %233, %234, %231 : vector<8x8xi1>, vector<8x8xf32>
    %236 = arith.truncf %235 : vector<8x8xf32> to vector<8x8xbf16>
    %237 = arith.truncf %194 : vector<8x16xf32> to vector<8x16xbf16>
    %cst_82 = arith.constant dense<0.000000e+00> : vector<8x16xf32>
    %238 = tpu.matmul %236, %237, %cst_82 {dimension_numbers = #tpu.dot_dimension_numbers<[1], [0], [0], [1], [0, 0, 1, 1], [], []>} : vector<8x8xbf16>, vector<8x16xbf16>, vector<8x16xf32> -> vector<8x16xf32>
    %239 = vector.extract_strided_slice %31 {offsets = [8, 16], sizes = [8, 16], strides = [1, 1]} : vector<16x64xf32> to vector<8x16xf32>
    %240 = vector.extract_strided_slice %31 {offsets = [8, 48], sizes = [8, 16], strides = [1, 1]} : vector<16x64xf32> to vector<8x16xf32>
    %241 = vector.extract_strided_slice %34 {offsets = [8, 16], sizes = [8, 16], strides = [1, 1]} : vector<16x32xf32> to vector<8x16xf32>
    %242 = vector.extract_strided_slice %35 {offsets = [0, 16], sizes = [8, 16], strides = [1, 1]} : vector<8x32xf32> to vector<8x16xf32>
    %c1_83 = arith.constant 1 : index
    %c0_84 = arith.constant 0 : index
    %243 = vector.load %arg9[%c1_83, %c0_84] : memref<4x16xf32, #tpu.memory_space<vmem>>, vector<1x16xf32>
    %c3_85 = arith.constant 3 : index
    %c0_86 = arith.constant 0 : index
    %244 = vector.load %arg9[%c3_85, %c0_86] : memref<4x16xf32, #tpu.memory_space<vmem>>, vector<1x16xf32>
    %245 = vector.broadcast %243 : vector<1x16xf32> to vector<8x16xf32>
    %246 = arith.addf %239, %245 : vector<8x16xf32>
    %247 = arith.truncf %246 : vector<8x16xf32> to vector<8x16xbf16>
    %248 = arith.truncf %240 : vector<8x16xf32> to vector<8x16xbf16>
    %cst_87 = arith.constant dense<0.000000e+00> : vector<8x8xf32>
    %249 = tpu.matmul %247, %248, %cst_87 {dimension_numbers = #tpu.dot_dimension_numbers<[1], [1], [0], [0], [0, 0, 1, 0], [], []>} : vector<8x16xbf16>, vector<8x16xbf16>, vector<8x8xf32> -> vector<8x8xf32>
    %250 = vector.broadcast %244 : vector<1x16xf32> to vector<8x16xf32>
    %251 = arith.addf %239, %250 : vector<8x16xf32>
    %252 = arith.truncf %251 : vector<8x16xf32> to vector<8x16xbf16>
    %253 = arith.truncf %242 : vector<8x16xf32> to vector<8x16xbf16>
    %cst_88 = arith.constant dense<0.000000e+00> : vector<8x8xf32>
    %254 = tpu.matmul %252, %253, %cst_88 {dimension_numbers = #tpu.dot_dimension_numbers<[1], [1], [0], [0], [0, 0, 1, 0], [], []>} : vector<8x16xbf16>, vector<8x16xbf16>, vector<8x8xf32> -> vector<8x8xf32>
    %255 = vector.extract_strided_slice %254 {offsets = [0, 1], sizes = [8, 7], strides = [1, 1]} : vector<8x8xf32> to vector<8x7xf32>
    %256 = tpu.concatenate %255, %51 in 1 : vector<8x7xf32>, vector<8x1xf32> -> vector<8x8xf32>
    %257 = arith.select %50, %256, %254 : vector<8x8xi1>, vector<8x8xf32>
    %258 = vector.extract_strided_slice %257 {offsets = [0, 2], sizes = [8, 6], strides = [1, 1]} : vector<8x8xf32> to vector<8x6xf32>
    %259 = tpu.concatenate %258, %56 in 1 : vector<8x6xf32>, vector<8x2xf32> -> vector<8x8xf32>
    %260 = arith.select %55, %259, %257 : vector<8x8xi1>, vector<8x8xf32>
    %261 = vector.extract_strided_slice %260 {offsets = [0, 4], sizes = [8, 4], strides = [1, 1]} : vector<8x8xf32> to vector<8x4xf32>
    %262 = tpu.concatenate %261, %61 in 1 : vector<8x4xf32>, vector<8x4xf32> -> vector<8x8xf32>
    %263 = arith.select %60, %262, %260 : vector<8x8xi1>, vector<8x8xf32>
    %264 = arith.addf %249, %263 : vector<8x8xf32>
    %cst_89 = arith.constant 2.500000e-01 : f32
    %265 = vector.broadcast %cst_89 : f32 to vector<8x8xf32>
    %266 = arith.mulf %264, %265 : vector<8x8xf32>
    %cst_90 = arith.constant -6.500000e+04 : f32
    %267 = vector.broadcast %cst_90 : f32 to vector<8x8xf32>
    %268 = arith.select %184, %267, %266 : vector<8x8xi1>, vector<8x8xf32>
    %cst_91 = arith.constant dense<0xFF800000> : vector<8xf32>
    %269 = vector.multi_reduction <maximumf>, %268, %cst_91 [1] : vector<8x8xf32> to vector<8xf32>
    %270 = vector.shape_cast %269 : vector<8xf32> to vector<8x1xf32>
    %271 = vector.broadcast %270 : vector<8x1xf32> to vector<8x8xf32>
    %272 = arith.subf %268, %271 : vector<8x8xf32>
    %273 = math.exp %272 : vector<8x8xf32>
    %cst_92 = arith.constant dense<0.000000e+00> : vector<8xf32>
    %274 = vector.multi_reduction <add>, %273, %cst_92 [1] : vector<8x8xf32> to vector<8xf32>
    %275 = vector.shape_cast %274 : vector<8xf32> to vector<8x1xf32>
    %276 = tpu.reciprocal %275 {approx = true} : vector<8x1xf32> -> vector<8x1xf32>
    %277 = vector.broadcast %276 : vector<8x1xf32> to vector<8x8xf32>
    %278 = arith.mulf %273, %277 : vector<8x8xf32>
    %cst_93 = arith.constant 0.000000e+00 : f32
    %279 = vector.shape_cast %191 : vector<8x1xi1> to vector<8x1xi1>
    %280 = vector.broadcast %279 : vector<8x1xi1> to vector<8x8xi1>
    %281 = vector.broadcast %cst_93 : f32 to vector<8x8xf32>
    %282 = arith.select %280, %281, %278 : vector<8x8xi1>, vector<8x8xf32>
    %283 = arith.truncf %282 : vector<8x8xf32> to vector<8x8xbf16>
    %284 = arith.truncf %241 : vector<8x16xf32> to vector<8x16xbf16>
    %cst_94 = arith.constant dense<0.000000e+00> : vector<8x16xf32>
    %285 = tpu.matmul %283, %284, %cst_94 {dimension_numbers = #tpu.dot_dimension_numbers<[1], [0], [0], [1], [0, 0, 1, 1], [], []>} : vector<8x8xbf16>, vector<8x16xbf16>, vector<8x16xf32> -> vector<8x16xf32>
    %286 = tpu.concatenate %238, %285 in 1 : vector<8x16xf32>, vector<8x16xf32> -> vector<8x32xf32>
    %287 = arith.truncf %286 : vector<8x32xf32> to vector<8x32xbf16>
    %c0_95 = arith.constant 0 : index
    %c0_96 = arith.constant 0 : index
    %288 = vector.load %arg8[%c0_95, %c0_96] : memref<32x32xbf16, #tpu.memory_space<vmem>>, vector<32x32xbf16>
    %cst_97 = arith.constant dense<0.000000e+00> : vector<8x32xf32>
    %289 = tpu.matmul %287, %288, %cst_97 {dimension_numbers = #tpu.dot_dimension_numbers<[1], [0], [0], [1], [0, 0, 1, 1], [], []>} : vector<8x32xbf16>, vector<32x32xbf16>, vector<8x32xf32> -> vector<8x32xf32>
    %cst_98 = arith.constant 0.000000e+00 : f32
    %290 = vector.broadcast %cst_98 : f32 to vector<8x32xf32>
    %291 = arith.maximumf %289, %290 : vector<8x32xf32>
    %292 = arith.truncf %291 : vector<8x32xf32> to vector<8x32xbf16>
    %c8_99 = arith.constant 8 : index
    %c0_100 = arith.constant 0 : index
    %293 = vector.load %arg10[%c8_99, %c0_100] : memref<16x32xbf16, #tpu.memory_space<vmem>>, vector<8x32xbf16>
    tpu.vector_store %arg10[%c8_99, %c0_100], %292 {strides = array<i32>} : memref<16x32xbf16, #tpu.memory_space<vmem>>, vector<8x32xbf16>,
    return
  }
  func.func @transform_0(%arg0: i32) -> (i32, i32) {
    %c0_i32 = arith.constant 0 : i32
    %c0_i32_0 = arith.constant 0 : i32
    return %arg0, %c0_i32 : i32, i32
  }
  func.func @transform_1(%arg0: i32) -> (i32, i32) {
    %c0_i32 = arith.constant 0 : i32
    %c0_i32_0 = arith.constant 0 : i32
    return %arg0, %c0_i32 : i32, i32
  }
  func.func @transform_2(%arg0: i32) -> (i32, i32, i32) {
    %c0_i32 = arith.constant 0 : i32
    %c0_i32_0 = arith.constant 0 : i32
    %c0_i32_1 = arith.constant 0 : i32
    return %arg0, %c0_i32, %c0_i32_0 : i32, i32, i32
  }
  func.func @transform_3(%arg0: i32) -> (i32, i32) {
    %c0_i32 = arith.constant 0 : i32
    %c0_i32_0 = arith.constant 0 : i32
    %c0_i32_1 = arith.constant 0 : i32
    return %c0_i32, %c0_i32_0 : i32, i32
  }
  func.func @transform_4(%arg0: i32) -> (i32, i32) {
    %c0_i32 = arith.constant 0 : i32
    %c0_i32_0 = arith.constant 0 : i32
    %c0_i32_1 = arith.constant 0 : i32
    return %c0_i32, %c0_i32_0 : i32, i32
  }
  func.func @transform_5(%arg0: i32) -> (i32, i32) {
    %c0_i32 = arith.constant 0 : i32
    %c0_i32_0 = arith.constant 0 : i32
    %c0_i32_1 = arith.constant 0 : i32
    return %c0_i32, %c0_i32_0 : i32, i32
  }
  func.func @transform_6(%arg0: i32) -> (i32, i32) {
    %c0_i32 = arith.constant 0 : i32
    %c0_i32_0 = arith.constant 0 : i32
    %c0_i32_1 = arith.constant 0 : i32
    return %c0_i32, %c0_i32_0 : i32, i32
  }
  func.func @transform_7(%arg0: i32) -> (i32, i32) {
    %c0_i32 = arith.constant 0 : i32
    %c0_i32_0 = arith.constant 0 : i32
    %c0_i32_1 = arith.constant 0 : i32
    return %c0_i32, %c0_i32_0 : i32, i32
  }
  func.func @transform_8(%arg0: i32) -> (i32, i32) {
    %c0_i32 = arith.constant 0 : i32
    %c0_i32_0 = arith.constant 0 : i32
    %c0_i32_1 = arith.constant 0 : i32
    return %c0_i32, %c0_i32_0 : i32, i32
  }
  func.func @transform_9(%arg0: i32) -> (i32, i32) {
    %c0_i32 = arith.constant 0 : i32
    %c0_i32_0 = arith.constant 0 : i32
    return %arg0, %c0_i32 : i32, i32
  }
}

</mosaic_0001>

<bundles_post_ra>
// kernel: tpu_custom_call.1
= control target key start
LH: loop header
LB: loop body
LE: loop exit
PB: predicated region body
PF: predicated region fallthrough
CT: control target
= control target key end

     0   :  { %14 = vsyncpa [#allocation3], 0  ;;  %s2106_s0 = inlined_call_operand.vmem [shape: f32[16,32], index: 0, kind: input, shape index: {}]   ;;  %s2107_s1 = inlined_call_operand.vmem [shape: s32[16,1], index: 1, kind: input, shape index: {}]   ;;  %s2108_s2 = inlined_call_operand.hbm [shape: s32[2,1,8], index: 2, kind: input, shape index: {}]   ;;  %s2109_s3 = inlined_call_operand.hbm [shape: f32[4,32], index: 3, kind: input, shape index: {}]   ;;  %s2110_s4 = inlined_call_operand.vmem [shape: bf16[32,64], index: 4, kind: input, shape index: {}]   ;;  %s2111_s5 = inlined_call_operand.hbm [shape: bf16[32,32], index: 5, kind: input, shape index: {}]   ;;  %s2112_s6 = inlined_call_operand.hbm [shape: f32[8,32], index: 6, kind: input, shape index: {}]   ;;  %s2113_s7 = inlined_call_operand.hbm [shape: bf16[32,32], index: 7, kind: input, shape index: {}]   ;;  %s2114_s8 = inlined_call_operand.vmem [shape: f32[4,16], index: 8, kind: input, shape index: {}]   ;;  %s2115_s9 = inlined_call_operand.hbm [shape: bf16[16,32], index: 9, kind: output, shape index: {}]  }
   0x1   :  { %15 = vsyncpa [#allocation6], 0 }
   0x2   :  { %16 = vsyncpa [#allocation9], 0 }
   0x3   :  { %17 = vsyncpa [#allocation4], 0  ;;  %s1645_s30 = smov [#allocation5]   ;;  %s1646_s11 = smov [#allocation8]  }
   0x4   :  { %s40_s10 = sshll.u32 %s1645_s30, 4  ;;  %s64_s12 = sshll.u32 %s1646_s11, 4  ;;  %s41_s10 = int_to_ptr.vmem [resolvable:$true] %s40_s10  ;;  %s65_s12 = int_to_ptr.vmem [resolvable:$true] %s64_s12 }
   0x5   :  { %s1505_s15 = scalar_lea.hbm %s2109_s3, 64 }
   0x6   :  { %p1506_p0 = scmp.ne.s32.totalorder %s2109_s3, %s1505_s15  ;;  %p1509_p1 = scmp.lt.u32.totalorder %s1505_s15, %s2109_s3 }
   0x8   :  { %p1511_p2 = pnand %p1509_p1, %p1506_p0 }
   0xa   :  { %1514 = shalt.err (!%p1511_p2)
}
   0xb   :  { %s1515_s20 = scalar_lea.vmem %s41_s10, 64  ;;  %p1520_p4 = scmp.lt.s32.totalorder %s41_s10, %s41_s10 }
   0xc   :  { %p1516_p3 = scmp.ne.s32.totalorder %s41_s10, %s1515_s20  ;;  %p1521_p5 = scmp.lt.s32.totalorder %s1515_s20, %s1515_s20 }
   0xe   :  { %p1522_p6 = por %p1521_p5, %p1520_p4 }
  0x10   :  { %p1523_p7 = pnand %p1522_p6, %p1516_p3 }
  0x12   :  { %1526 = shalt.err (!%p1523_p7)
}
  0x13   :  { %43 = dma.hbm_to_vmem [thread:$0]  %s2109_s3, 64, %s41_s10, [#allocation6]  }
  0x14   :  { %s1527_s25 = scalar_lea.hbm %s2112_s6, 128 }
  0x15   :  { %p1528_p8 = scmp.ne.s32.totalorder %s2112_s6, %s1527_s25  ;;  %p1531_p9 = scmp.lt.u32.totalorder %s1527_s25, %s2112_s6 }
  0x17   :  { %p1533_p10 = pnand %p1531_p9, %p1528_p8 }
  0x19   :  { %1536 = shalt.err (!%p1533_p10)
}
  0x1a   :  { %s1537_s30 = scalar_lea.vmem %s65_s12, 128  ;;  %p1542_p12 = scmp.lt.s32.totalorder %s65_s12, %s65_s12 }
  0x1b   :  { %p1538_p11 = scmp.ne.s32.totalorder %s65_s12, %s1537_s30  ;;  %p1543_p13 = scmp.lt.s32.totalorder %s1537_s30, %s1537_s30 }
  0x1d   :  { %p1544_p0 = por %p1543_p13, %p1542_p12 }
  0x1f   :  { %p1545_p1 = pnand %p1544_p0, %p1538_p11 }
  0x21   :  { %1548 = shalt.err (!%p1545_p1)
}
  0x22   :  { %67 = dma.hbm_to_vmem [thread:$0]  %s2112_s6, 128, %s65_s12, [#allocation9]  }
  0x23   :  { %s1647_s11 = smov [#allocation2]   ;;  %s1549_s16 = scalar_lea.hbm %s2108_s2, 32 }
  0x24   :  { %s27_s13 = sshll.u32 %s1647_s11, 4  ;;  %p1550_p2 = scmp.ne.s32.totalorder %s2108_s2, %s1549_s16  ;;  %s28_s13 = int_to_ptr.vmem [resolvable:$true] %s27_s13 }
  0x25   :  { %p1553_p3 = scmp.lt.u32.totalorder %s1549_s16, %s2108_s2 }
  0x27   :  { %p1555_p4 = pnand %p1553_p3, %p1550_p2 }
  0x29   :  { %1558 = shalt.err (!%p1555_p4)
}
  0x2a   :  { %s1559_s21 = scalar_lea.vmem %s28_s13, 32  ;;  %p1564_p6 = scmp.lt.s32.totalorder %s28_s13, %s28_s13 }
  0x2b   :  { %p1560_p5 = scmp.ne.s32.totalorder %s28_s13, %s1559_s21  ;;  %p1565_p7 = scmp.lt.s32.totalorder %s1559_s21, %s1559_s21 }
  0x2d   :  { %p1566_p8 = por %p1565_p7, %p1564_p6 }
  0x2f   :  { %p1567_p9 = pnand %p1566_p8, %p1560_p5 }
  0x31   :  { %1570 = shalt.err (!%p1567_p9)
}
  0x32   :  { %s1648_s6 = smov 16   ;;  %s1649_s12 = smov 1  }
  0x33   :  { %33 = dma.hbm_to_vmem [thread:$0]  %s2108_s2, 32, %s28_s13, [#allocation3], %s1648_s6, %s1648_s6, %s1649_s12  }
  0x34   :  { %s1650_s24 = smov [#allocation7]   ;;  %s1571_s28 = scalar_lea.hbm %s2111_s5, 256 }
  0x35   :  { %s51_s25 = sshll.u32 %s1650_s24, 4  ;;  %p1572_p10 = scmp.ne.s32.totalorder %s2111_s5, %s1571_s28  ;;  %s52_s25 = int_to_ptr.vmem [resolvable:$true] %s51_s25 }
  0x36   :  { %p1575_p11 = scmp.lt.u32.totalorder %s1571_s28, %s2111_s5 }
  0x38   :  { %p1577_p12 = pnand %p1575_p11, %p1572_p10 }
  0x3a   :  { %1580 = shalt.err (!%p1577_p12)
}
  0x3b   :  { %s1581_s11 = scalar_lea.vmem %s52_s25, 256  ;;  %p1586_p0 = scmp.lt.s32.totalorder %s52_s25, %s52_s25 }
  0x3c   :  { %p1582_p13 = scmp.ne.s32.totalorder %s52_s25, %s1581_s11  ;;  %p1587_p1 = scmp.lt.s32.totalorder %s1581_s11, %s1581_s11 }
  0x3e   :  { %p1588_p2 = por %p1587_p1, %p1586_p0 }
  0x40   :  { %p1589_p3 = pnand %p1588_p2, %p1582_p13 }
  0x42   :  { %1592 = shalt.err (!%p1589_p3)
}
  0x43   :  { %s1651_s2 = smov 64   ;;  %s1652_s13 = smov 4  }
  0x44   :  { %57 = dma.hbm_to_vmem [thread:$0]  %s2111_s5, 256, %s52_s25, [#allocation6], %s1651_s2, %s1651_s2, %s1652_s13  }
  0x45   :  { %s1653_s16 = smov [#allocation10]   ;;  %s1593_s20 = scalar_lea.hbm %s2113_s7, 256 }
  0x46   :  { %s73_s17 = sshll.u32 %s1653_s16, 4  ;;  %p1594_p4 = scmp.ne.s32.totalorder %s2113_s7, %s1593_s20  ;;  %s74_s17 = int_to_ptr.vmem [resolvable:$true] %s73_s17 }
  0x47   :  { %p1597_p5 = scmp.lt.u32.totalorder %s1593_s20, %s2113_s7 }
  0x49   :  { %p1599_p6 = pnand %p1597_p5, %p1594_p4 }
  0x4b   :  { %1602 = shalt.err (!%p1599_p6)
}
  0x4c   :  { %s1603_s24 = scalar_lea.vmem %s74_s17, 256  ;;  %p1608_p8 = scmp.lt.s32.totalorder %s74_s17, %s74_s17 }
  0x4d   :  { %p1604_p7 = scmp.ne.s32.totalorder %s74_s17, %s1603_s24  ;;  %p1609_p9 = scmp.lt.s32.totalorder %s1603_s24, %s1603_s24 }
  0x4f   :  { %p1610_p10 = por %p1609_p9, %p1608_p8 }
  0x51   :  { %p1611_p11 = pnand %p1610_p10, %p1604_p7 }
  0x53   :  { %1614 = shalt.err (!%p1611_p11)
}
  0x54   :  { %79 = dma.hbm_to_vmem [thread:$0]  %s2113_s7, 256, %s74_s17, [#allocation9], %s1651_s2, %s1651_s2, %s1652_s13  }
  0x55   :  { %1637 = dma.done.wait [#allocation3], 32  }
  0x56   :  { %1638 = vsyncadd [#allocation3], 4294967264 }
  0x57   :  { %1639 = dma.done.wait [#allocation6], 320  }
  0x58   :  { %1640 = vsyncadd [#allocation6], 4294966976 }
  0x59   :  { %1641 = dma.done.wait [#allocation9], 384  }
  0x5a   :  { %1642 = vsyncadd [#allocation9], 4294966912  ;;  %vm100_vm0 = vcmask 261120   ;;  %v98_v0 = vld [vmem:[%s2106_s0] sm:$0xff]  ;;  %v99_v1 = vld [vmem:[%s2106_s0 + $0x8] sm:$0xff]  ;;  %v1654_v16 = vmov 0.0  }
  0x5b   :  { %v101_v2 = vsel %vm100_vm0, %v98_v0, 0.0  ;;  %v104_v3 = vsel %vm100_vm0, %v99_v1, 0.0  ;;  %v1477_v14 = vld [vmem:[%s2110_s4] sm:$0xff]   ;;  %1353 = vmatprep.subr.bf16.mxu0 %v1654_v16  ;;  %1361 = vmatprep.subr.bf16.mxu1 %v1654_v16  ;;  %v1479_v17 = vld [vmem:[%s2110_s4 + $0x8] sm:$0xff]   ;;  %vm1655_vm1 = vmmov 0   ;;  %v278_v30 = vld [vmem:[#allocation8] sm:$0xff] }
  0x5c   :  { %102 = vadd.xlane.f32.xlu0 %v101_v2  ;;  %v1478_v15 = vld [vmem:[#allocation7] sm:$0xff]   ;;  %1354 = vmatpush3.bf16.msra.mxu0 %v1477_v14  ;;  %v1480_v18 = vld [vmem:[#allocation7 + $0x8] sm:$0xff]   ;;  %v1279_v27 = vld [vmem:[#allocation5] ss:$0 sm:$0xff]  ;;  %v1808_v38 = vpack.c.bf16 %v278_v30, %v278_v30  ;;  %vm327_vm2 = vcmask 130048   ;;  %vm465_vm3 = vcmask 1043456  }
  0x5d   :  { %1362 = vmatpush3.bf16.msra.mxu1 %v1478_v15  ;;  %1355 = vmatprep.subr.bf16.mxu0 %v1654_v16  ;;  %v1281_v28 = vld [vmem:[#allocation5 + $0x2] ss:$0 sm:$0xff]  ;;  %v1280_v34 = vld [vmem:[#allocation5 + $0x1] ss:$0 sm:$0xff]  ;;  %v1282_v35 = vld [vmem:[#allocation5 + $0x3] ss:$0 sm:$0xff] }
  0x5e   :  { %1363 = vmatprep.subr.bf16.mxu1 %v1654_v16  ;;  %1357 = vmatprep.mubr.msk.bf16.mxu0 %vm1655_vm1, %v1654_v16  ;;  %v1812_v45 = vsel %vm327_vm2, %v1808_v38, 0  ;;  %v1291_v46 = vld [vmem:[%s2114_s8 + $0x2] ss:$0 sm:$0xff]  ;;  %v1290_v54 = vld [vmem:[%s2114_s8] ss:$0 sm:$0xff]  ;;  %s1656_s15 = smov 96  }
  0x5f   :  { %1365 = vmatprep.mubr.msk.bf16.mxu1 %vm1655_vm1, %v1654_v16  ;;  %s1658_s18 = smov 127   ;;  %vm378_vm4 = vcmask 56320   ;;  %s1659_s19 = smov 126   ;;  %vm385_vm6 = vcmask 48128   ;;  %vm392_vm8 = vcmask 31744   ;;  %vm306_vm13 = vcmask 64512  }
  0x60   :  { %105 = vadd.xlane.f32.xlu0 %v104_v3  ;;  %1356 = vmatpush3.bf16.msra.mxu0 %v1479_v17  ;;  %v294_v3 = vld [vmem:[%s2107_s1] sm:$0xff]  ;;  %s1660_s12 = smov 124   ;;  %s1661_s22 = smov 112   ;;  %vm783_vm15 = vcmask 257024  }
  0x61   :  { %1364 = vmatpush3.bf16.msra.mxu1 %v1480_v18  ;;  %1369 = vmatprep.subr.bf16.mxu0 %v1654_v16  ;;  %v1879_v18 = vld [vmem:[%s2114_s8 + $0x3] ss:$0 sm:$0xff] }
  0x62   :  { %1375 = vmatprep.subr.bf16.mxu1 %v1654_v16 }
  0xe9   :  { %v103_v4 = vpop.xlane.xlu0 %102 }
  0xea   :  { %v108_v5 = vmul.f32 0.03125, %v103_v4  ;;  %v1657_v4 = vmov 0  }
  0xeb   :  { %1476 = vset.pattern.permute.xlu0 %v1657_v4 }
  0xec   :  { %v110_v6 = vsub.f32 %v98_v0, %v108_v5 }
  0xed   :  { %v106_v7 = vpop.xlane.xlu0 %105 }
  0xee   :  { %v109_v8 = vmul.f32 0.03125, %v106_v7  ;;  %v112_v9 = vmul.f32 %v110_v6, %v110_v6 }
  0xf0   :  { %v111_v10 = vsub.f32 %v99_v1, %v109_v8  ;;  %v114_v11 = vsel %vm100_vm0, %v112_v9, 0.0  ;;  %v279_v9 = vlaneseq }
  0xf1   :  { %115 = vadd.xlane.f32.xlu1 %v114_v11 }
  0xf2   :  { %v113_v12 = vmul.f32 %v111_v10, %v111_v10 }
  0xf4   :  { %v117_v13 = vsel %vm100_vm0, %v113_v12, 0.0 }
  0xf5   :  { %118 = vadd.xlane.f32.xlu1 %v117_v13 }
 0x17e   :  { %v116_v19 = vpop.xlane.xlu1 %115 }
 0x17f   :  { %v120_v20 = vmul.f32 0.03125, %v116_v19 }
 0x181   :  { %v122_v21 = vadd.f32 1e-05, %v120_v20 }
 0x182   :  { %v119_v22 = vpop.xlane.xlu1 %118 }
 0x183   :  { %1485 = vrsqrt.f32 %v122_v21  ;;  %v121_v23 = vmul.f32 0.03125, %v119_v22 }
 0x185   :  { %v123_v24 = vadd.f32 1e-05, %v121_v23 }
 0x187   :  { %1487 = vrsqrt.f32 %v123_v24 }
 0x18d   :  { %v1486_v25 = vpop.eup %1485 }
 0x18e   :  { %v126_v26 = vmul.f32 %v1486_v25, %v110_v6 }
 0x190   :  { %v133_v32 = vmul.f32 %v1279_v27, %v126_v26  ;;  %v147_v33 = vmul.f32 %v1281_v28, %v126_v26 }
 0x191   :  { %v1488_v29 = vpop.eup %1487 }
 0x192   :  { %v127_v31 = vmul.f32 %v1488_v29, %v111_v10  ;;  %v140_v39 = vadd.f32 %v1280_v34, %v133_v32  ;;  %v154_v41 = vadd.f32 %v1282_v35, %v147_v33  ;;  %v1865_v10 = vshrl.u32 %v279_v9, 7 }
 0x193   :  { %v1902_v33 = vand.u32 127, %v279_v9 }
 0x194   :  { %v134_v36 = vmul.f32 %v1279_v27, %v127_v31  ;;  %v148_v37 = vmul.f32 %v1281_v28, %v127_v31  ;;  %v287_v11 = vsub.s32 7, %v1865_v10  ;;  %v1898_v31 = vld [vmem:[%s2114_s8 + $0x1] ss:$0 sm:$0xff]  ;;  %s1662_s8 = smov 80  }
 0x195   :  { %vm283_vm10 = vcmp.ge.s32.totalorder %v1902_v33, %v1865_v10 }
 0x196   :  { %v141_v40 = vadd.f32 %v1280_v34, %v134_v36  ;;  %v155_v42 = vadd.f32 %v1282_v35, %v148_v37  ;;  %v288_v12 = vand.u32 1, %v287_v11  ;;  %v290_v23 = vand.u32 2, %v287_v11  ;;  %v1289_v34 = vld [vmem:[#allocation2] ss:$0 sm:$0xff] }
 0x197   :  { %v292_v32 = vand.u32 4, %v287_v11 }
 0x198   :  { %v156_v43 = vpack.c.bf16 %v141_v40, %v140_v39  ;;  %v217_v44 = vpack.c.bf16 %v155_v42, %v154_v41  ;;  %vm1868_vm5 = vcmp.ne.s32.totalorder %v288_v12, 0  ;;  %vm1883_vm7 = vcmp.ne.s32.totalorder %v290_v23, 0 }
 0x199   :  { %vm1904_vm9 = vcmp.ne.s32.totalorder %v292_v32, 0 }
 0x19a   :  { %1358 = vmatmul.mubr.msk.bf16.vlgmr.msra.gmra.mrb[0].mxu0 %vm100_vm0, %v156_v43  ;;  %1366 = vmatmul.mubr.msk.bf16.vlgmr.msra.gmra.mrb[0].mxu1 %vm100_vm0, %v217_v44 }
 0x19b   :  { %1370 = vmatpush3.bf16.xpose.msra.mxu0 %v1812_v45  ;;  %1371 = vmatprep.mubr.msk.bf16.mxu0 %vm1655_vm1, %v1654_v16 }
 0x19c   :  { %1381 = vmatprep.subr.bf16.mxu0 %v1654_v16  ;;  %1377 = vmatprep.mubr.msk.bf16.mxu1 %vm1655_vm1, %v1654_v16 }
 0x26d   :  { %v1825_v47 = vpop.f32.mrb[0].mxu0  ;;  %v271_v48 = vpop.f32.mrb[0].mxu1 }
 0x26e   :  { %v324_v49 = vadd.f32 %v1291_v46, %v1825_v47  ;;  %v1828_v50 = vpack.c.bf16 %v271_v48, %v271_v48  ;;  %v1359_v51 = vpop.f32.mrb[1].mxu0  ;;  %v1367_v52 = vpop.f32.mrb[1].mxu1  ;;  %v1832_v53 = vpack.c.bf16 %v1825_v47, %v1825_v47  ;;  %v317_v1 = vadd.f32 %v1290_v54, %v1825_v47 }
 0x26f   :  { %v1837_v55 = vpop.f32.mrb[2].mxu0  ;;  %v1839_v56 = vpop.f32.mrb[2].mxu1 }
 0x270   :  { %v325_v57 = vpack.c.bf16 %v324_v49, %v324_v49  ;;  %v467_v58 = vsel %vm465_vm3, %v1828_v50, 0  ;;  %v1844_v59 = vadd.f32 %v1290_v54, %v1837_v55  ;;  %v1368_v60 = vpop.f32.mrb[3].mxu1  ;;  %396 = vrot.lane.b32.xlu0 %v1832_v53, %s1656_s15  ;;  %v1360_v61 = vpop.f32.mrb[3].mxu0  ;;  %v1849_v62 = vadd.f32 %v1291_v46, %v1837_v55 }
 0x271   :  { %v318_v2 = vpack.c.bf16 %v317_v1, %v317_v1 }
 0x272   :  { %1372 = vmatmul.mubr.msk.bf16.vlgmr.msra.gmra.mrb[4].mxu0 %vm327_vm2, %v325_v57 }
 0x273   :  { %1382 = vmatpush3.bf16.msra.mxu0 %v467_v58  ;;  %1383 = vmatprep.mubr.msk.bf16.mxu0 %vm1655_vm1, %v1654_v16 }
 0x274   :  { %1393 = vmatprep.subr.bf16.mxu0 %v1654_v16  ;;  %297 = vperm.xlu0 %1476, %v294_v3  }
 0x2e2   :  { %v397_v63 = vpop.permute.xlu0 %396 }
 0x2e3   :  { %v402_v0 = vsel %vm327_vm2, %v397_v63, 0 }
 0x2e4   :  { %1376 = vmatpush3.bf16.xpose.msra.mxu1 %v402_v0 }
 0x2e5   :  { %1387 = vmatprep.subr.bf16.mxu1 %v1654_v16 }
 0x2eb   :  { %1378 = vmatmul.mubr.msk.bf16.vlgmr.msra.gmra.mrb[4].mxu1 %vm327_vm2, %v318_v2 }
 0x2ec   :  { %1389 = vmatprep.mubr.msk.bf16.mxu1 %vm1655_vm1, %v1654_v16 }
 0x2f3   :  { %v298_v37 = vpop.permute.xlu0 %297 }
 0x2f4   :  { %vm303_vm11 = vcmp.gt.s32.totalorder %v298_v37, %v1289_v34 }
 0x2f5   :  { %vm1916_vm12 = vmor %vm303_vm11, %vm283_vm10 }
 0x2f6   :  { %v305_v60 = vsel %vm1916_vm12, 1.0, %v1654_v16 }
 0x2f7   :  { %v307_v61 = vsel %vm306_vm13, %v305_v60, inf }
 0x345   :  { %v368_v5 = vpop.f32.mrb[4].mxu0 }
 0x346   :  { %375 = vrot.lane.b32.xlu1 %v368_v5, %s1658_s18  ;;  %v1373_v6 = vpop.f32.mrb[5].mxu0 }
 0x347   :  { %v371_v7 = vpop.f32.mrb[6].mxu0 }
 0x348   :  { %v1374_v8 = vpop.f32.mrb[7].mxu0 }
 0x3b8   :  { %v376_v14 = vpop.permute.xlu1 %375 }
 0x3b9   :  { %v379_v15 = vsel %vm378_vm4, %v376_v14, 0.0 }
 0x3ba   :  { %v380_v17 = vsel %vm1868_vm5, %v379_v15, %v368_v5 }
 0x3bb   :  { %382 = vrot.lane.b32.xlu1 %v380_v17, %s1659_s19 }
 0x3be   :  { %v438_v19 = vpop.f32.mrb[4].mxu1 }
 0x3bf   :  { %v1379_v20 = vpop.f32.mrb[5].mxu1  ;;  %526 = vrot.lane.b32.xlu1 %v1879_v18, %s1648_s6 }
 0x3c0   :  { %v441_v21 = vpop.f32.mrb[6].mxu1 }
 0x3c1   :  { %v1380_v22 = vpop.f32.mrb[7].mxu1 }
 0x42d   :  { %v383_v25 = vpop.permute.xlu1 %382 }
 0x42e   :  { %v386_v26 = vsel %vm385_vm6, %v383_v25, 0.0 }
 0x42f   :  { %v387_v27 = vsel %vm1883_vm7, %v386_v26, %v380_v17 }
 0x430   :  { %389 = vrot.lane.b32.xlu1 %v387_v27, %s1660_s12 }
 0x431   :  { %v527_v28 = vpop.permute.xlu1 %526 }
 0x432   :  { %v529_v29 = vadd.f32 %v527_v28, %v1825_v47 }
 0x434   :  { %v530_v30 = vpack.c.bf16 %v529_v29, %v529_v29  ;;  %535 = vrot.lane.b32.xlu1 %v1808_v38, %s1661_s22 }
 0x436   :  { %532 = vrot.lane.b32.xlu0 %v530_v30, %s1661_s22 }
 0x43a   :  { %516 = vrot.lane.b32.xlu0 %v1898_v31, %s1648_s6 }
 0x4a2   :  { %v390_v36 = vpop.permute.xlu1 %389 }
 0x4a3   :  { %v393_v38 = vsel %vm392_vm8, %v390_v36, 0.0 }
 0x4a4   :  { %v394_v39 = vsel %vm1904_vm9, %v393_v38, %v387_v27 }
 0x4a5   :  { %v439_v40 = vadd.f32 %v438_v19, %v394_v39 }
 0x4a6   :  { %v536_v42 = vpop.permute.xlu1 %535 }
 0x4a7   :  { %v1921_v43 = vsel %vm327_vm2, %v536_v42, 0  ;;  %v444_v44 = vmul.f32 0.25, %v439_v40 }
 0x4a8   :  { %1388 = vmatpush3.bf16.xpose.msra.mxu1 %v1921_v43  ;;  %v533_v49 = vpop.permute.xlu0 %532 }
 0x4a9   :  { %v445_v46 = vsel %vm1916_vm12, -65000.0, %v444_v44  ;;  %1399 = vmatprep.subr.bf16.mxu1 %v1654_v16  ;;  %v1970_v44 = vpack.c.bf16 %v1837_v55, %v1837_v55 }
 0x4aa   :  { %v446_v48 = vsel %vm306_vm13, %v445_v46, -inf }
 0x4ab   :  { %447 = vmax.xlane.f32.xlu1 %v446_v48 }
 0x4ac   :  { %v517_v63 = vpop.permute.xlu0 %516 }
 0x4ad   :  { %v519_v0 = vadd.f32 %v517_v63, %v1825_v47  ;;  %v1985_v63 = vpack.c.bf16 %v1839_v56, %v1839_v56 }
 0x4af   :  { %1390 = vmatmul.mubr.msk.bf16.vlgmr.msra.gmra.mrb[8].mxu1 %vm327_vm2, %v533_v49  ;;  %v520_v1 = vpack.c.bf16 %v519_v0, %v519_v0  ;;  %v816_v0 = vpack.c.bf16 %v1849_v62, %v1849_v62 }
 0x4b0   :  { %1401 = vmatprep.mubr.msk.bf16.mxu1 %vm1655_vm1, %v1654_v16 }
 0x4bc   :  { %604 = vrot.lane.b32.xlu1 %v1832_v53, %s1662_s8 }
 0x538   :  { %v448_v51 = vpop.xlane.xlu1 %447 }
 0x539   :  { %v449_v52 = vsub.f32 %v445_v46, %v448_v51 }
 0x53b   :  { %v450_v54 = vmul.f32 1.442695, %v449_v52 }
 0x53c   :  { %v605_v9 = vpop.permute.xlu1 %604 }
 0x53d   :  { %1489 = vpow2.f32 %v450_v54  ;;  %v610_v47 = vsel %vm327_vm2, %v605_v9, 0 }
 0x547   :  { %v1490_v57 = vpop.eup %1489 }
 0x548   :  { %v452_v58 = vsel %vm306_vm13, %v1490_v57, 0.0 }
 0x549   :  { %453 = vadd.xlane.f32.xlu0 %v452_v58 }
 0x54d   :  { %308 = vmin.xlane.f32.xlu0 %v307_v61 }
 0x563   :  { %602 = vrot.lane.b32.xlu0 %v520_v1, %s1661_s22  ;;  %v949_v1 = vsel %vm465_vm3, %v1985_v63, 0 }
 0x582   :  { %v577_v53 = vpop.f32.mrb[8].mxu1 }
 0x583   :  { %584 = vrot.lane.b32.xlu1 %v577_v53, %s1658_s18  ;;  %v1391_v2 = vpop.f32.mrb[9].mxu1 }
 0x584   :  { %v580_v3 = vpop.f32.mrb[10].mxu1 }
 0x585   :  { %v1392_v4 = vpop.f32.mrb[11].mxu1 }
 0x5d6   :  { %v454_v5 = vpop.xlane.xlu0 %453 }
 0x5d7   :  { %1491 = vrcp.f32 %v454_v5 }
 0x5da   :  { %v309_v6 = vpop.xlane.xlu0 %308 }
 0x5db   :  { %vm310_vm14 = vcmp.gt.f32.partialorder %v309_v6, 0.5 }
 0x5de   :  { %v603_v14 = vpop.permute.xlu0 %602 }
 0x5e1   :  { %v1492_v7 = vpop.eup %1491 }
 0x5e2   :  { %v456_v8 = vmul.f32 %v1492_v7, %v1490_v57 }
 0x5e4   :  { %v459_v11 = vsel %vm310_vm14, 0.0, %v456_v8 }
 0x5e5   :  { %v460_v12 = vpack.c.bf16 %v459_v11, %v459_v11 }
 0x5e7   :  { %1384 = vmatmul.mubr.msk.bf16.vlgmr.msra.gmra.mrb[8].mxu0 %vm306_vm13, %v460_v12 }
 0x5e8   :  { %1394 = vmatpush3.bf16.xpose.msra.mxu0 %v610_v47  ;;  %1395 = vmatprep.mubr.msk.bf16.mxu0 %vm1655_vm1, %v1654_v16 }
 0x5e9   :  { %1405 = vmatprep.subr.bf16.mxu0 %v1654_v16 }
 0x5ef   :  { %1396 = vmatmul.mubr.msk.bf16.vlgmr.msra.gmra.mrb[12].mxu0 %vm327_vm2, %v603_v14 }
 0x5f0   :  { %1409 = vmatprep.mubr.msk.bf16.mxu0 %vm1655_vm1, %v1654_v16 }
 0x5f5   :  { %v585_v15 = vpop.permute.xlu1 %584 }
 0x5f6   :  { %v587_v17 = vsel %vm378_vm4, %v585_v15, 0.0 }
 0x5f7   :  { %v588_v19 = vsel %vm1868_vm5, %v587_v17, %v577_v53  ;;  %v1482_v53 = vld [vmem:[#allocation10 + $0x8] sm:$0xff]  }
 0x5f8   :  { %590 = vrot.lane.b32.xlu1 %v588_v19, %s1659_s19 }
 0x66a   :  { %v591_v20 = vpop.permute.xlu1 %590 }
 0x66b   :  { %v593_v21 = vsel %vm385_vm6, %v591_v20, 0.0  ;;  %v785_v20 = vld [vmem:[%s2107_s1 + $0x8] sm:$0xff]  ;;  %s1663_s1 = smov [#allocation11]  }
 0x66c   :  { %v594_v22 = vsel %vm1883_vm7, %v593_v21, %v588_v19  ;;  %s1265_s26 = sshll.u32 %s1663_s1, 4  ;;  %s1266_s26 = int_to_ptr.vmem [resolvable:$true] %s1265_s26 }
 0x66d   :  { %596 = vrot.lane.b32.xlu1 %v594_v22, %s1660_s12  ;;  %p1620_p13 = scmp.lt.s32.totalorder %s1266_s26, %s1266_s26 }
 0x6ba   :  { %v1958_v23 = vpop.f32.mrb[8].mxu0 }
 0x6bb   :  { %v1385_v25 = vpop.f32.mrb[9].mxu0 }
 0x6bc   :  { %v506_v26 = vpop.f32.mrb[10].mxu0 }
 0x6bd   :  { %v1386_v27 = vpop.f32.mrb[11].mxu0 }
 0x6c2   :  { %v646_v28 = vpop.f32.mrb[12].mxu0 }
 0x6c3   :  { %v1397_v29 = vpop.f32.mrb[13].mxu0 }
 0x6c4   :  { %v649_v30 = vpop.f32.mrb[14].mxu0 }
 0x6c5   :  { %v1398_v32 = vpop.f32.mrb[15].mxu0 }
 0x6df   :  { %v597_v34 = vpop.permute.xlu1 %596 }
 0x6e0   :  { %v599_v36 = vsel %vm392_vm8, %v597_v34, 0.0 }
 0x6e1   :  { %v600_v37 = vsel %vm1904_vm9, %v599_v36, %v594_v22 }
 0x6e2   :  { %v647_v38 = vadd.f32 %v646_v28, %v600_v37 }
 0x6e4   :  { %v652_v39 = vmul.f32 0.25, %v647_v38 }
 0x6e6   :  { %v653_v40 = vsel %vm1916_vm12, -65000.0, %v652_v39  ;;  %v1303_v39 = vld [vmem:[#allocation2 + $0x1] ss:$0 sm:$0xff] }
 0x6e7   :  { %v654_v42 = vsel %vm306_vm13, %v653_v40, -inf }
 0x6e8   :  { %655 = vmax.xlane.f32.xlu0 %v654_v42 }
 0x6fe   :  { %668 = vrot.lane.b32.xlu0 %v1828_v50, %s1661_s22 }
 0x702   :  { %879 = vrot.lane.b32.xlu0 %v1970_v44, %s1656_s15 }
 0x775   :  { %v656_v46 = vpop.xlane.xlu0 %655 }
 0x776   :  { %v657_v48 = vsub.f32 %v653_v40, %v656_v46 }
 0x778   :  { %v658_v49 = vmul.f32 1.442695, %v657_v48 }
 0x779   :  { %v669_v51 = vpop.permute.xlu0 %668 }
 0x77a   :  { %1493 = vpow2.f32 %v658_v49  ;;  %v674_v41 = vsel %vm465_vm3, %v669_v51, 0 }
 0x77b   :  { %1400 = vmatpush3.bf16.msra.mxu1 %v674_v41 }
 0x77c   :  { %1413 = vmatprep.subr.bf16.mxu1 %v1654_v16 }
 0x77d   :  { %v880_v9 = vpop.permute.xlu0 %879 }
 0x77e   :  { %v885_v47 = vsel %vm327_vm2, %v880_v9, 0 }
 0x784   :  { %v1494_v52 = vpop.eup %1493 }
 0x785   :  { %v660_v50 = vsel %vm306_vm13, %v1494_v52, 0.0 }
 0x786   :  { %661 = vadd.xlane.f32.xlu1 %v660_v50 }
 0x813   :  { %v662_v54 = vpop.xlane.xlu1 %661 }
 0x814   :  { %1495 = vrcp.f32 %v662_v54 }
 0x81e   :  { %v1496_v57 = vpop.eup %1495 }
 0x81f   :  { %v664_v58 = vmul.f32 %v1496_v57, %v1494_v52 }
 0x821   :  { %v665_v60 = vsel %vm310_vm14, 0.0, %v664_v58 }
 0x822   :  { %v666_v61 = vpack.c.bf16 %v665_v60, %v665_v60 }
 0x824   :  { %1402 = vmatmul.mubr.msk.bf16.vlgmr.msra.gmra.mrb[12].mxu1 %vm306_vm13, %v666_v61 }
 0x825   :  { %1414 = vmatpush3.bf16.xpose.msra.mxu1 %v1812_v45  ;;  %1415 = vmatprep.mubr.msk.bf16.mxu1 %vm1655_vm1, %v1654_v16  ;;  %v1481_v45 = vld [vmem:[#allocation10] sm:$0xff]  }
 0x826   :  { %1425 = vmatprep.subr.bf16.mxu1 %v1654_v16  ;;  %1406 = vmatpush3.bf16.msra.mxu0 %v1481_v45 }
 0x827   :  { %1407 = vmatprep.subr.bf16.mxu0 %v1654_v16 }
 0x82a   :  { %1408 = vmatpush3.bf16.msra.mxu0 %v1482_v53 }
 0x82b   :  { %1419 = vmatprep.subr.bf16.mxu0 %v1654_v16 }
 0x82c   :  { %1416 = vmatmul.mubr.msk.bf16.vlgmr.msra.gmra.mrb[16].mxu1 %vm327_vm2, %v816_v0 }
 0x82d   :  { %1426 = vmatpush3.bf16.msra.mxu1 %v949_v1  ;;  %1427 = vmatprep.mubr.msk.bf16.mxu1 %vm1655_vm1, %v1654_v16 }
 0x82e   :  { %1437 = vmatprep.subr.bf16.mxu1 %v1654_v16 }
 0x8f7   :  { %v710_v56 = vpop.f32.mrb[12].mxu1 }
 0x8f8   :  { %717 = vrot.lane.b32.xlu1 %v710_v56, %s1648_s6  ;;  %v1403_v62 = vpop.f32.mrb[13].mxu1 }
 0x8f9   :  { %v713_v2 = vpop.f32.mrb[14].mxu1 }
 0x8fa   :  { %v1404_v3 = vpop.f32.mrb[15].mxu1 }
 0x8ff   :  { %v854_v4 = vpop.f32.mrb[16].mxu1 }
 0x900   :  { %861 = vrot.lane.b32.xlu1 %v854_v4, %s1658_s18  ;;  %v1417_v5 = vpop.f32.mrb[17].mxu1 }
 0x901   :  { %v857_v6 = vpop.f32.mrb[18].mxu1 }
 0x902   :  { %v1418_v7 = vpop.f32.mrb[19].mxu1 }
 0x904   :  { %1008 = vrot.lane.b32.xlu1 %v1879_v18, %s1648_s6  ;;  %v809_v18 = vpack.c.bf16 %v1844_v59, %v1844_v59 }
 0x96a   :  { %v718_v8 = vpop.permute.xlu1 %717 }
 0x96b   :  { %v720_v11 = vsel %vm327_vm2, %v1958_v23, %v718_v8 }
 0x96c   :  { %v721_v12 = vpack.c.bf16 %v720_v11, %v720_v11 }
 0x96e   :  { %1410 = vmatmul.mubr.msk.bf16.vlgmr.msra.gmra.mrb[16].mxu0 %vm100_vm0, %v721_v12 }
 0x96f   :  { %1420 = vmatpush3.bf16.xpose.msra.mxu0 %v885_v47  ;;  %1421 = vmatprep.mubr.msk.bf16.mxu0 %vm1655_vm1, %v1654_v16 }
 0x970   :  { %1431 = vmatprep.subr.bf16.mxu0 %v1654_v16 }
 0x972   :  { %v862_v14 = vpop.permute.xlu1 %861 }
 0x973   :  { %v864_v15 = vsel %vm378_vm4, %v862_v14, 0.0 }
 0x974   :  { %v865_v17 = vsel %vm1868_vm5, %v864_v15, %v854_v4 }
 0x975   :  { %867 = vrot.lane.b32.xlu0 %v865_v17, %s1659_s19 }
 0x976   :  { %v1009_v19 = vpop.permute.xlu1 %1008  ;;  %1422 = vmatmul.mubr.msk.bf16.vlgmr.msra.gmra.mrb[20].mxu0 %vm327_vm2, %v809_v18 }
 0x977   :  { %v1011_v21 = vadd.f32 %v1009_v19, %v1837_v55  ;;  %1432 = vmatpush3.bf16.xpose.msra.mxu0 %v1921_v43  ;;  %1433 = vmatprep.mubr.msk.bf16.mxu0 %vm1655_vm1, %v1654_v16 }
 0x978   :  { %1443 = vmatprep.subr.bf16.mxu0 %v1654_v16 }
 0x979   :  { %789 = vperm.xlu0 %1476, %v785_v20   ;;  %v1012_v59 = vpack.c.bf16 %v1011_v21, %v1011_v21 }
 0x97d   :  { %1014 = vrot.lane.b32.xlu0 %v1012_v59, %s1661_s22 }
 0x981   :  { %998 = vrot.lane.b32.xlu0 %v1898_v31, %s1648_s6 }
 0x9e7   :  { %v868_v22 = vpop.permute.xlu0 %867 }
 0x9e8   :  { %v870_v23 = vsel %vm385_vm6, %v868_v22, 0.0 }
 0x9e9   :  { %v871_v25 = vsel %vm1883_vm7, %v870_v23, %v865_v17 }
 0x9ea   :  { %873 = vrot.lane.b32.xlu1 %v871_v25, %s1660_s12 }
 0x9f8   :  { %v790_v43 = vpop.permute.xlu0 %789 }
 0x9f9   :  { %vm795_vm11 = vcmp.gt.s32.totalorder %v790_v43, %v1303_v39 }
 0x9fa   :  { %vm2040_vm12 = vmor %vm795_vm11, %vm283_vm10 }
 0x9fb   :  { %v797_v1 = vsel %vm2040_vm12, 1.0, %v1654_v16 }
 0x9fc   :  { %v1015_v26 = vpop.permute.xlu0 %1014 }
 0x9fd   :  { %1434 = vmatmul.mubr.msk.bf16.vlgmr.msra.gmra.mrb[24].mxu0 %vm327_vm2, %v1015_v26 }
 0x9fe   :  { %1445 = vmatprep.mubr.msk.bf16.mxu0 %vm1655_vm1, %v1654_v16 }
 0xa00   :  { %v999_v45 = vpop.permute.xlu0 %998 }
 0xa01   :  { %v1001_v53 = vadd.f32 %v999_v45, %v1837_v55 }
 0xa03   :  { %v1002_v56 = vpack.c.bf16 %v1001_v53, %v1001_v53 }
 0xa41   :  { %v775_v27 = vpop.f32.mrb[16].mxu0 }
 0xa42   :  { %v781_v28 = vmax.f32 %v775_v27, 0.0  ;;  %v1411_v29 = vpop.f32.mrb[17].mxu0 }
 0xa43   :  { %v778_v30 = vpop.f32.mrb[18].mxu0 }
 0xa44   :  { %v782_v31 = vpack.c.bf16 %v781_v28, %v781_v28  ;;  %v1412_v32 = vpop.f32.mrb[19].mxu0 }
 0xa46   :  { %784 = vst.msk [vmem:[#allocation11] sm:$0xf] %vm783_vm15, %v782_v31 }
 0xa49   :  { %v921_v34 = vpop.f32.mrb[20].mxu0 }
 0xa4a   :  { %v1423_v36 = vpop.f32.mrb[21].mxu0 }
 0xa4b   :  { %v924_v37 = vpop.f32.mrb[22].mxu0 }
 0xa4c   :  { %v1424_v38 = vpop.f32.mrb[23].mxu0 }
 0xa5c   :  { %v874_v40 = vpop.permute.xlu1 %873 }
 0xa5d   :  { %v876_v42 = vsel %vm392_vm8, %v874_v40, 0.0 }
 0xa5e   :  { %v877_v46 = vsel %vm1904_vm9, %v876_v42, %v871_v25 }
 0xa5f   :  { %v922_v48 = vadd.f32 %v921_v34, %v877_v46  ;;  %v1484_v46 = vld [vmem:[#allocation10 + $0x8] sm:$0xff]  }
 0xa61   :  { %v927_v49 = vmul.f32 0.25, %v922_v48 }
 0xa63   :  { %v928_v41 = vsel %vm2040_vm12, -65000.0, %v927_v49 }
 0xa64   :  { %v929_v52 = vsel %vm306_vm13, %v928_v41, -inf }
 0xa65   :  { %930 = vmax.xlane.f32.xlu1 %v929_v52 }
 0xa76   :  { %1080 = vrot.lane.b32.xlu1 %v1970_v44, %s1662_s8  ;;  %v798_v44 = vsel %vm306_vm13, %v797_v1, inf }
 0xad0   :  { %v1053_v50 = vpop.f32.mrb[24].mxu0 }
 0xad1   :  { %1060 = vrot.lane.b32.xlu1 %v1053_v50, %s1658_s18  ;;  %v1435_v54 = vpop.f32.mrb[25].mxu0 }
 0xad2   :  { %v1056_v57 = vpop.f32.mrb[26].mxu0 }
 0xad3   :  { %v1436_v58 = vpop.f32.mrb[27].mxu0 }
 0xaf2   :  { %v931_v10 = vpop.xlane.xlu1 %930 }
 0xaf3   :  { %v932_v33 = vsub.f32 %v928_v41, %v931_v10 }
 0xaf5   :  { %v933_v60 = vmul.f32 1.442695, %v932_v33 }
 0xaf6   :  { %v1081_v62 = vpop.permute.xlu1 %1080 }
 0xaf7   :  { %1497 = vpow2.f32 %v933_v60  ;;  %v1086_v11 = vsel %vm327_vm2, %v1081_v62, 0 }
 0xb01   :  { %v1498_v61 = vpop.eup %1497 }
 0xb02   :  { %v935_v0 = vsel %vm306_vm13, %v1498_v61, 0.0 }
 0xb03   :  { %936 = vadd.xlane.f32.xlu0 %v935_v0 }
 0xb07   :  { %799 = vmin.xlane.f32.xlu0 %v798_v44 }
 0xb1d   :  { %1078 = vrot.lane.b32.xlu0 %v1002_v56, %s1661_s22 }
 0xb43   :  { %v1061_v2 = vpop.permute.xlu1 %1060 }
 0xb44   :  { %v1063_v3 = vsel %vm378_vm4, %v1061_v2, 0.0 }
 0xb45   :  { %v1064_v4 = vsel %vm1868_vm5, %v1063_v3, %v1053_v50 }
 0xb46   :  { %1066 = vrot.lane.b32.xlu1 %v1064_v4, %s1659_s19 }
 0xb90   :  { %v937_v5 = vpop.xlane.xlu0 %936 }
 0xb91   :  { %1499 = vrcp.f32 %v937_v5 }
 0xb94   :  { %v800_v6 = vpop.xlane.xlu0 %799 }
 0xb95   :  { %vm801_vm10 = vcmp.gt.f32.partialorder %v800_v6, 0.5 }
 0xb98   :  { %v1079_v13 = vpop.permute.xlu0 %1078 }
 0xb9b   :  { %v1500_v7 = vpop.eup %1499 }
 0xb9c   :  { %v939_v8 = vmul.f32 %v1500_v7, %v1498_v61 }
 0xb9e   :  { %v942_v55 = vsel %vm801_vm10, 0.0, %v939_v8 }
 0xb9f   :  { %v943_v9 = vpack.c.bf16 %v942_v55, %v942_v55 }
 0xba1   :  { %1428 = vmatmul.mubr.msk.bf16.vlgmr.msra.gmra.mrb[20].mxu1 %vm306_vm13, %v943_v9 }
 0xba2   :  { %1438 = vmatpush3.bf16.xpose.msra.mxu1 %v1086_v11  ;;  %1439 = vmatprep.mubr.msk.bf16.mxu1 %vm1655_vm1, %v1654_v16 }
 0xba3   :  { %1449 = vmatprep.subr.bf16.mxu1 %v1654_v16 }
 0xba9   :  { %1440 = vmatmul.mubr.msk.bf16.vlgmr.msra.gmra.mrb[24].mxu1 %vm327_vm2, %v1079_v13 }
 0xbaa   :  { %1453 = vmatprep.mubr.msk.bf16.mxu1 %vm1655_vm1, %v1654_v16 }
 0xbb8   :  { %v1067_v12 = vpop.permute.xlu1 %1066 }
 0xbb9   :  { %v1069_v47 = vsel %vm385_vm6, %v1067_v12, 0.0 }
 0xbba   :  { %v1070_v14 = vsel %vm1883_vm7, %v1069_v47, %v1064_v4 }
 0xbbb   :  { %1072 = vrot.lane.b32.xlu1 %v1070_v14, %s1660_s12 }
 0xc2d   :  { %v1073_v17 = vpop.permute.xlu1 %1072 }
 0xc2e   :  { %v1075_v21 = vsel %vm392_vm8, %v1073_v17, 0.0 }
 0xc2f   :  { %v1076_v59 = vsel %vm1904_vm9, %v1075_v21, %v1070_v14 }
 0xc74   :  { %v985_v15 = vpop.f32.mrb[20].mxu1 }
 0xc75   :  { %v1429_v18 = vpop.f32.mrb[21].mxu1 }
 0xc76   :  { %v988_v19 = vpop.f32.mrb[22].mxu1 }
 0xc77   :  { %v1430_v20 = vpop.f32.mrb[23].mxu1 }
 0xc7c   :  { %v1122_v22 = vpop.f32.mrb[24].mxu1 }
 0xc7d   :  { %v1123_v23 = vadd.f32 %v1122_v22, %v1076_v59  ;;  %v1441_v25 = vpop.f32.mrb[25].mxu1 }
 0xc7e   :  { %v1125_v43 = vpop.f32.mrb[26].mxu1 }
 0xc7f   :  { %v1128_v26 = vmul.f32 0.25, %v1123_v23  ;;  %v1442_v27 = vpop.f32.mrb[27].mxu1 }
 0xc81   :  { %v1129_v24 = vsel %vm2040_vm12, -65000.0, %v1128_v26 }
 0xc82   :  { %v1130_v28 = vsel %vm306_vm13, %v1129_v24, -inf }
 0xc83   :  { %1131 = vmax.xlane.f32.xlu0 %v1130_v28 }
 0xc99   :  { %1144 = vrot.lane.b32.xlu0 %v1985_v63, %s1661_s22  ;;  %v1483_v63 = vld [vmem:[#allocation10] sm:$0xff]  }
 0xc9a   :  { %1450 = vmatpush3.bf16.msra.mxu1 %v1483_v63 }
 0xc9b   :  { %1451 = vmatprep.subr.bf16.mxu1 %v1654_v16 }
 0xc9e   :  { %1452 = vmatpush3.bf16.msra.mxu1 %v1484_v46 }
 0xd10   :  { %v1132_v29 = vpop.xlane.xlu0 %1131 }
 0xd11   :  { %v1133_v30 = vsub.f32 %v1129_v24, %v1132_v29 }
 0xd13   :  { %v1134_v31 = vmul.f32 1.442695, %v1133_v30 }
 0xd14   :  { %v1145_v35 = vpop.permute.xlu0 %1144 }
 0xd15   :  { %1501 = vpow2.f32 %v1134_v31  ;;  %v1150_v32 = vsel %vm465_vm3, %v1145_v35, 0 }
 0xd16   :  { %1444 = vmatpush3.bf16.msra.mxu0 %v1150_v32 }
 0xd1f   :  { %v1502_v34 = vpop.eup %1501 }
 0xd20   :  { %v1136_v36 = vsel %vm306_vm13, %v1502_v34, 0.0 }
 0xd21   :  { %1137 = vadd.xlane.f32.xlu1 %v1136_v36 }
 0xdae   :  { %v1138_v37 = vpop.xlane.xlu1 %1137 }
 0xdaf   :  { %1503 = vrcp.f32 %v1138_v37 }
 0xdb9   :  { %v1504_v38 = vpop.eup %1503 }
 0xdba   :  { %v1140_v39 = vmul.f32 %v1504_v38, %v1502_v34 }
 0xdbc   :  { %v1141_v40 = vsel %vm801_vm10, 0.0, %v1140_v39 }
 0xdbd   :  { %v1142_v42 = vpack.c.bf16 %v1141_v40, %v1141_v40 }
 0xdbf   :  { %1446 = vmatmul.mubr.msk.bf16.vlgmr.msra.gmra.mrb[28].mxu0 %vm306_vm13, %v1142_v42 }
 0xe92   :  { %v1186_v48 = vpop.f32.mrb[28].mxu0 }
 0xe93   :  { %1193 = vrot.lane.b32.xlu1 %v1186_v48, %s1648_s6  ;;  %v1447_v49 = vpop.f32.mrb[29].mxu0  ;;  %s1615_s6 = scalar_lea.vmem %s1266_s26, 128 }
 0xe94   :  { %v1189_v51 = vpop.f32.mrb[30].mxu0  ;;  %p1616_p12 = scmp.ne.s32.totalorder %s1266_s26, %s1615_s6  ;;  %p1621_p0 = scmp.lt.s32.totalorder %s1615_s6, %s1615_s6 }
 0xe95   :  { %v1448_v41 = vpop.f32.mrb[31].mxu0 }
 0xe96   :  { %p1622_p1 = por %p1621_p0, %p1620_p13 }
 0xe98   :  { %p1623_p2 = pnand %p1622_p1, %p1616_p12 }
 0xf05   :  { %v1194_v52 = vpop.permute.xlu1 %1193 }
 0xf06   :  { %v1196_v50 = vsel %vm327_vm2, %v985_v15, %v1194_v52 }
 0xf07   :  { %v1197_v54 = vpack.c.bf16 %v1196_v50, %v1196_v50 }
 0xf09   :  { %1454 = vmatmul.mubr.msk.bf16.vlgmr.msra.gmra.mrb[28].mxu1 %vm100_vm0, %v1197_v54 }
 0xfdc   :  { %v1251_v57 = vpop.f32.mrb[28].mxu1 }
 0xfdd   :  { %v1257_v58 = vmax.f32 %v1251_v57, 0.0  ;;  %v1455_v10 = vpop.f32.mrb[29].mxu1 }
 0xfde   :  { %v1254_v16 = vpop.f32.mrb[30].mxu1 }
 0xfdf   :  { %v1258_v33 = vpack.c.bf16 %v1257_v58, %v1257_v58  ;;  %v1456_v60 = vpop.f32.mrb[31].mxu1 }
 0xfe1   :  { %1259 = vst.msk [vmem:[#allocation11 + $0x4] sm:$0xf] %vm783_vm15, %v1258_v33 }
 0xfe2   :  { %1626 = shalt.err (!%p1623_p2)
}
 0xfe3   :  { %s1627_s29 = scalar_lea.hbm %s2115_s9, 128 }
 0xfe4   :  { %p1628_p3 = scmp.ne.s32.totalorder %s2115_s9, %s1627_s29  ;;  %p1631_p4 = scmp.lt.u32.totalorder %s1627_s29, %s2115_s9 }
 0xfe6   :  { %p1633_p5 = pnand %p1631_p4, %p1628_p3 }
 0xfe8   :  { %1636 = shalt.err (!%p1633_p5)
}
 0xfe9   :  { %1271 = dma.vmem_to_hbm [thread:$0]  %s1266_s26, 128, %s2115_s9, [#allocation4], %s1651_s2, %s1651_s2, %s1652_s13  }
 0xfea   :  { %1643 = dma.done.wait [#allocation4], 128  }
 0xfeb   :  { %1644 = vsyncadd [#allocation4], 4294967168 }
 0xfec   :  { %1275 = vsyncpa [#allocation3], 1 }
 0xfed   :  { %1276 = vsyncpa [#allocation6], 1 }
 0xfee   :  { %1277 = vsyncpa [#allocation9], 1 }
 0xfef   :  { %1278 = vsyncpa [#allocation4], 1 }

</bundles_post_ra>
